<compile_context>
chip_gen: v6e
topology: v6e:2x2x1
jax: 0.10.0
libtpu: 0.0.40
codegen_flags: <defaults>
</compile_context>

<pallas_src>
import math

import jax
import jax.numpy as jnp
from jax import lax
from jax.experimental import pallas as pl
from jax.experimental.pallas import tpu as pltpu

F32 = jnp.float32
BF16 = jnp.bfloat16


def _lane_roll(x, s):
    """jnp.roll(x, s, axis=-1) for a static shift: two lane slices + one concat."""
    d = x.shape[-1]
    s = s % d
    if s == 0:
        return x
    return jnp.concatenate([x[:, d - s:], x[:, :d - s]], axis=-1)


# ----------------------------- the single fused kernel -----------------------------
def _transf_enc_kernel(x_ref, adj_ref, w_aug0_ref, as0_ref, b0_ref,
                       w_aug_s_ref, as_s_ref, b_s_ref,
                       pe_ref, n1a_ref, n1b_ref, n2a_ref, n2b_ref,
                       gavg_ref, wqkv_ref, bqkv_ref,
                       gm_ref, bm_ref, gd_ref,
                       wo_ref, bo_ref, w1_ref, b1_ref, w2_ref, b2_ref,
                       wr_ref, br_ref, out_ref):
    n = x_ref.shape[0]
    hdim = w1_ref.shape[0]
    lh = pe_ref.shape[1]
    seq = lh // hdim
    kout = wr_ref.shape[1]

    # additive non-edge mask computed in-kernel (one select; no HBM temp)
    mask = jnp.where(adj_ref[...] > 0, F32(0.0), F32(-1e30))

    # ----------------- fused GAT stack (per-layer activations stay in VMEM/vregs) ---------
    def gat(x, w_aug, a_src, b, relu):
        # w_aug = [W | W @ att_dst^T]: h and the destination attention logit come out of
        # ONE matmul (no per-layer VPU mul + cross-lane reduce for e_dst).
        x_aug = jnp.dot(x.astype(BF16), w_aug, preferred_element_type=F32)   # [N, H+1]
        h = x_aug[:, :hdim]
        e_dst = x_aug[:, hdim:hdim + 1]                                      # [N, 1]
        # source logit as a row (single tiny dot_general, f32)
        e_src = lax.dot_general(a_src, h, (((1,), (1,)), ((), ())),
                                preferred_element_type=F32)                  # [1, N]
        e = e_dst + e_src                                                    # [N, N]
        e = jnp.where(e > 0, e, 0.2 * e) + mask                              # leaky_relu(0.2) + mask
        m = jnp.max(e, axis=-1, keepdims=True)
        p = jnp.exp(e - m)
        alpha = p * pl.reciprocal(jnp.sum(p, axis=-1, keepdims=True), approx=True)
        out = jnp.dot(alpha.astype(BF16), h.astype(BF16),
                      preferred_element_type=F32) + b                        # aggr='add' + bias
        return jnp.maximum(out, 0.0) if relu else out

    x = gat(x_ref[...], w_aug0_ref[...], as0_ref[...], b0_ref[...], relu=False)
    outs = [x]
    for i in range(w_aug_s_ref.shape[0]):                                    # statically unrolled
        x = gat(x, w_aug_s_ref[i], as_s_ref[i], b_s_ref[i], relu=True)
        outs.append(x)
    xs = jnp.concatenate(outs, axis=-1)                                      # [N, L*H] lane-dense

    # ----------------- encoder: PE + norm1 + attention + out-proj + FF + head -------------
    x = xs * F32(math.sqrt(hdim)) + pe_ref[...]                              # PositionalEncoder

    # norm1, lane-dense: per-position stats via one constant group-averaging matmul
    mean = jnp.dot(x, gavg_ref[...], preferred_element_type=F32)             # group mean per lane
    meansq = jnp.dot(x * x, gavg_ref[...], preferred_element_type=F32)       # group E[x^2] per lane
    var = (meansq - mean * mean) * F32(hdim / (hdim - 1.0))                  # unbiased (torch .std)
    std = jnp.sqrt(jnp.maximum(var, 0.0))
    x2 = n1a_ref[...] * (x - mean) / (std + F32(1e-6)) + n1b_ref[...]

    # fused q/k/v projection: one block-diagonal [L*H, 3*L*H] bf16 matmul
    qkv = jnp.dot(x2.astype(BF16), wqkv_ref[...], preferred_element_type=F32) + bqkv_ref[...]
    q = qkv[:, :lh]
    k = qkv[:, lh:2 * lh]
    v = qkv[:, 2 * lh:]

    # attention scores (heads=1), lane-dense: s[:, i*L+j] = q_i . k_j / sqrt(H).
    # Rolling k by m*H pairs query group i with key group (i-m)%L; the constant gm[m]
    # (entries 0 / 1/sqrt(H)) scatters each group-sum to its (i, j) score lane on the MXU.
    s_flat = jnp.dot(q * k, gm_ref[0], preferred_element_type=F32)           # m = 0, no roll
    for m in range(1, seq):
        s_flat = s_flat + jnp.dot(q * _lane_roll(k, m * hdim), gm_ref[m],
                                  preferred_element_type=F32)                # [N, L*L]

    # softmax over sources within each L-lane group; subtracting the per-node global max is a
    # valid shared shift for every group and needs only one cross-lane reduce.
    row_max = jnp.max(s_flat, axis=-1, keepdims=True)
    p = jnp.exp(s_flat - row_max)
    denom = jnp.dot(p, gd_ref[...], preferred_element_type=F32)              # group sums, broadcast
    alpha = p * pl.reciprocal(denom, approx=True)

    # o[:, i*H+c] = sum_j alpha[i, j] * v[:, j*H+c]   (same roll trick, alpha expanded via bm[m])
    o = jnp.dot(alpha, bm_ref[0], preferred_element_type=F32) * v
    for m in range(1, seq):
        o = o + jnp.dot(alpha, bm_ref[m], preferred_element_type=F32) * _lane_roll(v, m * hdim)

    # out-projection; wo_ref = P_scramble @ blockdiag(Wo) — the heads==1
    # scores.transpose(1,2).view() lane permutation is folded in (built in prepare_params).
    att_out = jnp.dot(o.astype(BF16), wo_ref[...], preferred_element_type=F32) + bo_ref[...]
    x = x + att_out                                                          # residual (dropout == id)

    # only position L-1 is needed downstream:
    #   (x + ff(norm2(x)))[:, L-1] + ff(norm2(x)[:, L-1]) == x[:, L-1] + 2*ff(norm2(x[:, L-1]))
    x_last = x[:, (seq - 1) * hdim:]                                         # [N, H]
    mu = jnp.mean(x_last, axis=-1, keepdims=True)
    d2 = x_last - mu
    std2 = jnp.sqrt(jnp.sum(d2 * d2, axis=-1, keepdims=True) * F32(1.0 / (hdim - 1)))
    x2_last = n2a_ref[...] * d2 / (std2 + F32(1e-6)) + n2b_ref[...]

    h1 = jnp.dot(x2_last.astype(BF16), w1_ref[...], preferred_element_type=F32) + b1_ref[...]
    h1 = jnp.maximum(h1, 0.0)
    ffo = jnp.dot(h1.astype(BF16), w2_ref[...], preferred_element_type=F32) + b2_ref[...]
    xf = x_last + 2.0 * ffo

    # regression + log_softmax(dim=1), f32
    logits = jnp.dot(xf, wr_ref[...], preferred_element_type=F32) + br_ref[...]
    mlog = jnp.max(logits, axis=-1, keepdims=True)
    lp = logits - mlog
    lp = lp - jnp.log(jnp.sum(jnp.exp(lp), axis=-1, keepdims=True))

    # single lane-dense [N, 128] output slab: [att scores (L*L) | log-probs (K) | zero pad]
    pad = out_ref.shape[1] - seq * seq - kout
    out_ref[...] = jnp.concatenate([s_flat, lp, jnp.zeros((n, pad), F32)], axis=-1)


# ----------------------------- one-time parameter preprocessing -----------------------------
def prepare_params(params):
    """Hoists every weight transformation out of the per-call path (run once)."""
    gat = params["gat"]
    enc = params["enc"]
    seq = len(gat)
    hdim = gat[0]["w"].shape[1]
    lh = seq * hdim

    def aug(p):                                    # [fin, H+1] = [W | W @ att_dst^T]
        return jnp.concatenate([p["w"], p["w"] @ p["att_dst"].T], axis=1).astype(BF16)

    w_aug0 = aug(gat[0])
    as0 = gat[0]["att_src"]
    b0 = gat[0]["b"]
    w_aug_s = jnp.stack([aug(p) for p in gat[1:]])           # [L-1, H, H+1] bf16
    as_s = jnp.stack([p["att_src"] for p in gat[1:]])        # [L-1, 1, H]
    b_s = jnp.stack([p["b"] for p in gat[1:]])               # [L-1, 1, H]

    eye_l = jnp.eye(seq, dtype=F32)
    bd = lambda w: jnp.kron(eye_l, w)                        # [L*H, L*H] block-diagonal
    tile = lambda b: jnp.tile(b, (1, seq))                   # [1,H] -> [1,L*H]

    wqkv = jnp.concatenate([bd(enc["wq"]), bd(enc["wk"]), bd(enc["wv"])], axis=1).astype(BF16)
    bqkv = jnp.concatenate([tile(enc["bq"]), tile(enc["bk"]), tile(enc["bv"])], axis=1)

    # lane permutation reproducing heads==1 "scores.transpose(1,2).contiguous().view(bs,-1,d)"
    d = jnp.arange(lh)
    perm = (d % seq) * hdim + d // seq
    P = jnp.zeros((lh, lh), F32).at[perm, d].set(1.0)
    wo = (P @ bd(enc["wo"])).astype(BF16)
    bo = tile(enc["bo"])

    # constant group-averaging matrix for lane-dense layer-norm stats
    gavg = bd(jnp.ones((hdim, hdim), F32) / hdim)            # [L*H, L*H]

    # constant gather/scatter matrices for the roll-based attention
    inv_sqrt_d = 1.0 / math.sqrt(hdim)
    i_idx = jnp.arange(lh) // hdim                           # query position per lane
    gm, bm = [], []
    for m in range(seq):
        col = i_idx * seq + (i_idx - m) % seq                # score lane (i*L + j) per activation lane
        gm.append(jnp.zeros((lh, seq * seq), F32).at[jnp.arange(lh), col].set(inv_sqrt_d))
        bm.append(jnp.zeros((seq * seq, lh), F32).at[col, jnp.arange(lh)].set(1.0))
    gm = jnp.stack(gm)                                       # [L, L*H, L*L]
    bm = jnp.stack(bm)                                       # [L, L*L, L*H]
    gd = jnp.kron(jnp.eye(seq, dtype=F32), jnp.ones((seq, seq), F32))   # [L*L, L*L] group-sum

    pe_flat = enc["pe"][:seq].reshape(1, lh)

    return dict(w_aug0=w_aug0, as0=as0, b0=b0, w_aug_s=w_aug_s, as_s=as_s, b_s=b_s,
                pe=pe_flat, n1a=tile(enc["n1a"]), n1b=tile(enc["n1b"]),
                n2a=enc["n2a"], n2b=enc["n2b"],
                gavg=gavg, wqkv=wqkv, bqkv=bqkv, gm=gm, bm=bm, gd=gd,
                wo=wo, bo=bo,
                w1=enc["w1"].astype(BF16), b1=enc["b1"],
                w2=enc["w2"].astype(BF16), b2=enc["b2"],
                wr=enc["wr"], br=enc["br"])


# ----------------------------- wrapper -----------------------------
def transf_enc_forward(x_in, adj, prep):
    """TransfEnc.forward (eval mode). Returns (log_probs [N,K], att_w [N,L,L])."""
    n = x_in.shape[0]
    seq = prep["gm"].shape[0]
    kout = prep["wr"].shape[1]
    assert seq * seq + kout <= 128

    args = (x_in, adj,
            prep["w_aug0"], prep["as0"], prep["b0"],
            prep["w_aug_s"], prep["as_s"], prep["b_s"],
            prep["pe"], prep["n1a"], prep["n1b"], prep["n2a"], prep["n2b"],
            prep["gavg"], prep["wqkv"], prep["bqkv"],
            prep["gm"], prep["bm"], prep["gd"],
            prep["wo"], prep["bo"], prep["w1"], prep["b1"], prep["w2"], prep["b2"],
            prep["wr"], prep["br"])
    vmem = pl.BlockSpec(memory_space=pltpu.MemorySpace.VMEM)
    out = pl.pallas_call(
        _transf_enc_kernel,
        out_shape=jax.ShapeDtypeStruct((n, 128), F32),       # one lane-dense output slab
        in_specs=[vmem] * len(args),
        out_specs=vmem,
    )(*args)
    att = out[:, :seq * seq].reshape(n, seq, seq)
    logp = out[:, seq * seq:seq * seq + kout]
    return logp, att


# ----------------------------- pure-JAX f32 reference (mirrors the PyTorch module) -----------------------------
def reference_forward(x_in, adj, params):
    gat = params["gat"]
    enc = params["enc"]
    seq = len(gat)
    hdim = gat[0]["w"].shape[1]

    def gat_layer(x, p):
        h = x @ p["w"]
        e = h @ p["att_dst"].T + (h @ p["att_src"].T).T      # e[i, j] = a_dst.h_i + a_src.h_j
        e = jnp.where(e > 0, e, 0.2 * e)
        e = jnp.where(adj > 0, e, -1e30)
        a = jax.nn.softmax(e, axis=-1)
        return a @ h + p["b"]

    x = gat_layer(x_in, gat[0])
    hs = [x]
    for p in gat[1:]:
        x = jax.nn.relu(gat_layer(x, p))
        hs.append(x)
    xs = jnp.stack(hs, axis=1)                               # [N, L, H]

    def norm(z, a, b):
        mu = z.mean(-1, keepdims=True)
        sd = jnp.sqrt(jnp.sum((z - mu) ** 2, -1, keepdims=True) / (hdim - 1))
        return a * (z - mu) / (sd + 1e-6) + b

    x = xs * math.sqrt(hdim) + enc["pe"][None, :seq, :]
    x2 = norm(x, enc["n1a"], enc["n1b"])
    q = x2 @ enc["wq"] + enc["bq"]
    k = x2 @ enc["wk"] + enc["bk"]
    v = x2 @ enc["wv"] + enc["bv"]
    att_w = jnp.einsum("nid,njd->nij", q, k) / math.sqrt(hdim)
    scores = jnp.einsum("nij,njd->nid", jax.nn.softmax(att_w, -1), v)
    concat = jnp.swapaxes(scores, 1, 2).reshape(scores.shape[0], seq, hdim)
    x = x + (concat @ enc["wo"] + enc["bo"])
    x2b = norm(x, enc["n2a"], enc["n2b"])
    ff = lambda z: jax.nn.relu(z @ enc["w1"] + enc["b1"]) @ enc["w2"] + enc["b2"]
    x = x + ff(x2b)
    xf = x[:, seq - 1] + ff(x2b[:, seq - 1])
    logits = xf @ enc["wr"] + enc["br"]
    return jax.nn.log_softmax(logits, axis=1), att_w


# ----------------------------- deterministic parameters -----------------------------
def build_pe(seq_len, d_model):
    pe = [[0.0] * d_model for _ in range(seq_len)]
    for pos in range(seq_len):
        for i in range(0, d_model, 2):
            pe[pos][i] = math.sin(pos / 10000 ** (2 * i / d_model))
            pe[pos][i + 1] = math.cos(pos / 10000 ** (2 * (i + 1) / d_model))
    return jnp.array(pe, F32)


def init_params(key, input_dim, hidden_dim, num_layers, num_outputs):
    keys = jax.random.split(key, 64)
    it = iter(keys)

    def nrm(shape, scale=0.1):
        return scale * jax.random.normal(next(it), shape, F32)

    gat = []
    fin = input_dim
    for _ in range(num_layers):
        gat.append(dict(w=nrm((fin, hidden_dim)),
                        b=jnp.zeros((1, hidden_dim), F32),
                        att_src=nrm((1, hidden_dim)),
                        att_dst=nrm((1, hidden_dim))))
        fin = hidden_dim

    dff = 4 * hidden_dim
    enc = dict(
        pe=build_pe(num_layers, hidden_dim),
        n1a=jnp.ones((1, hidden_dim), F32), n1b=jnp.zeros((1, hidden_dim), F32),
        n2a=jnp.ones((1, hidden_dim), F32), n2b=jnp.zeros((1, hidden_dim), F32),
        wq=nrm((hidden_dim, hidden_dim)), bq=nrm((1, hidden_dim), 0.01),
        wk=nrm((hidden_dim, hidden_dim)), bk=nrm((1, hidden_dim), 0.01),
        wv=nrm((hidden_dim, hidden_dim)), bv=nrm((1, hidden_dim), 0.01),
        wo=nrm((hidden_dim, hidden_dim)), bo=nrm((1, hidden_dim), 0.01),
        w1=nrm((hidden_dim, dff)), b1=nrm((1, dff), 0.01),
        w2=nrm((dff, hidden_dim)), b2=nrm((1, hidden_dim), 0.01),
        wr=nrm((hidden_dim, num_outputs)), br=jnp.zeros((1, num_outputs), F32),
    )
    return dict(gat=gat, enc=enc)


if __name__ == "__main__":
    N_NODES, F_IN, HID, N_LAYERS, N_OUT = 16, 8, 32, 4, 6

    key = jax.random.PRNGKey(0)
    kx, kp = jax.random.split(key)
    x_in = jax.random.normal(kx, (N_NODES, F_IN), F32)

    # ring graph (both directions) with self-loops, as dense adjacency adj[dst, src]
    adj = (jnp.eye(N_NODES) + jnp.eye(N_NODES, k=1) + jnp.eye(N_NODES, k=-1)
           + jnp.eye(N_NODES, k=N_NODES - 1) + jnp.eye(N_NODES, k=-(N_NODES - 1)))
    adj = (adj > 0).astype(F32)

    params = init_params(kp, F_IN, HID, N_LAYERS, N_OUT)
    prep = prepare_params(params)                            # one-time weight preprocessing

    fwd = jax.jit(transf_enc_forward)
    logp, att = fwd(x_in, adj, prep)
    jax.block_until_ready((logp, att))

    assert logp.shape == (N_NODES, N_OUT), logp.shape
    assert att.shape == (N_NODES, N_LAYERS, N_LAYERS), att.shape
    assert bool(jnp.all(jnp.isfinite(logp))) and bool(jnp.all(jnp.isfinite(att)))

    # numerical check against a pure-JAX f32 reference of the PyTorch module
    # (kernel uses bf16 MXU operands + approx reciprocals, hence the loose tolerance)
    logp_ref, att_ref = reference_forward(x_in, adj, params)
    assert jnp.allclose(att, att_ref, rtol=0.1, atol=0.1), \
        float(jnp.max(jnp.abs(att - att_ref)))
    assert jnp.allclose(logp, logp_ref, rtol=0.1, atol=0.1), \
        float(jnp.max(jnp.abs(logp - logp_ref)))

    print("KERNEL_OK")
</pallas_src>

<mosaic_0001>
module attributes {stable_mosaic.version = 11 : i64} {
  func.func @_transf_enc_kernel(%arg0: memref<16x8xf32, #tpu.memory_space<vmem>>, %arg1: memref<16x16xf32, #tpu.memory_space<vmem>>, %arg2: memref<8x33xbf16, #tpu.memory_space<vmem>>, %arg3: memref<1x32xf32, #tpu.memory_space<vmem>>, %arg4: memref<1x32xf32, #tpu.memory_space<vmem>>, %arg5: memref<3x32x33xbf16, #tpu.memory_space<vmem>>, %arg6: memref<3x1x32xf32, #tpu.memory_space<vmem>>, %arg7: memref<3x1x32xf32, #tpu.memory_space<vmem>>, %arg8: memref<1x128xf32, #tpu.memory_space<vmem>>, %arg9: memref<1x128xf32, #tpu.memory_space<vmem>>, %arg10: memref<1x128xf32, #tpu.memory_space<vmem>>, %arg11: memref<1x32xf32, #tpu.memory_space<vmem>>, %arg12: memref<1x32xf32, #tpu.memory_space<vmem>>, %arg13: memref<128x128xf32, #tpu.memory_space<vmem>>, %arg14: memref<128x384xbf16, #tpu.memory_space<vmem>>, %arg15: memref<1x384xf32, #tpu.memory_space<vmem>>, %arg16: memref<4x128x16xf32, #tpu.memory_space<vmem>>, %arg17: memref<4x16x128xf32, #tpu.memory_space<vmem>>, %arg18: memref<16x16xf32, #tpu.memory_space<vmem>>, %arg19: memref<128x128xbf16, #tpu.memory_space<vmem>>, %arg20: memref<1x128xf32, #tpu.memory_space<vmem>>, %arg21: memref<32x128xbf16, #tpu.memory_space<vmem>>, %arg22: memref<1x128xf32, #tpu.memory_space<vmem>>, %arg23: memref<128x32xbf16, #tpu.memory_space<vmem>>, %arg24: memref<1x32xf32, #tpu.memory_space<vmem>>, %arg25: memref<32x6xf32, #tpu.memory_space<vmem>>, %arg26: memref<1x6xf32, #tpu.memory_space<vmem>>, %arg27: memref<16x128xf32, #tpu.memory_space<vmem>>) attributes {dimension_semantics = [], scalar_prefetch = 0 : i64, scratch_operands = 0 : i64, tpu.core_type = #tpu.core_type<tc>} {
    %c0 = arith.constant 0 : index
    %c0_0 = arith.constant 0 : index
    %0 = vector.load %arg1[%c0, %c0_0] : memref<16x16xf32, #tpu.memory_space<vmem>>, vector<16x16xf32>
    %cst = arith.constant 0.000000e+00 : f32
    %1 = vector.broadcast %cst : f32 to vector<16x16xf32>
    %2 = arith.cmpf ogt, %0, %1 : vector<16x16xf32>
    %cst_1 = arith.constant 0.000000e+00 : f32
    %cst_2 = arith.constant -1.000000e+30 : f32
    %3 = vector.broadcast %cst_1 : f32 to vector<16x16xf32>
    %4 = vector.broadcast %cst_2 : f32 to vector<16x16xf32>
    %5 = arith.select %2, %3, %4 : vector<16x16xi1>, vector<16x16xf32>
    %c0_3 = arith.constant 0 : index
    %c0_4 = arith.constant 0 : index
    %6 = vector.load %arg0[%c0_3, %c0_4] : memref<16x8xf32, #tpu.memory_space<vmem>>, vector<16x8xf32>
    %c0_5 = arith.constant 0 : index
    %c0_6 = arith.constant 0 : index
    %7 = vector.load %arg2[%c0_5, %c0_6] : memref<8x33xbf16, #tpu.memory_space<vmem>>, vector<8x33xbf16>
    %c0_7 = arith.constant 0 : index
    %c0_8 = arith.constant 0 : index
    %8 = vector.load %arg3[%c0_7, %c0_8] : memref<1x32xf32, #tpu.memory_space<vmem>>, vector<1x32xf32>
    %c0_9 = arith.constant 0 : index
    %c0_10 = arith.constant 0 : index
    %9 = vector.load %arg4[%c0_9, %c0_10] : memref<1x32xf32, #tpu.memory_space<vmem>>, vector<1x32xf32>
    %10 = arith.truncf %6 : vector<16x8xf32> to vector<16x8xbf16>
    %cst_11 = arith.constant dense<0.000000e+00> : vector<16x33xf32>
    %11 = tpu.matmul %10, %7, %cst_11 {dimension_numbers = #tpu.dot_dimension_numbers<[1], [0], [0], [1], [0, 0, 1, 1], [], []>} : vector<16x8xbf16>, vector<8x33xbf16>, vector<16x33xf32> -> vector<16x33xf32>
    %12 = vector.extract_strided_slice %11 {offsets = [0, 0], sizes = [16, 32], strides = [1, 1]} : vector<16x33xf32> to vector<16x32xf32>
    %13 = vector.extract_strided_slice %11 {offsets = [0, 32], sizes = [16, 1], strides = [1, 1]} : vector<16x33xf32> to vector<16x1xf32>
    %cst_12 = arith.constant dense<0.000000e+00> : vector<1x16xf32>
    %14 = tpu.matmul %8, %12, %cst_12 {dimension_numbers = #tpu.dot_dimension_numbers<[1], [1], [0], [0], [0, 0, 1, 0], [], []>} : vector<1x32xf32>, vector<16x32xf32>, vector<1x16xf32> -> vector<1x16xf32>
    %15 = vector.broadcast %13 : vector<16x1xf32> to vector<16x16xf32>
    %16 = vector.broadcast %14 : vector<1x16xf32> to vector<16x16xf32>
    %17 = arith.addf %15, %16 : vector<16x16xf32>
    %cst_13 = arith.constant 0.000000e+00 : f32
    %18 = vector.broadcast %cst_13 : f32 to vector<16x16xf32>
    %19 = arith.cmpf ogt, %17, %18 : vector<16x16xf32>
    %cst_14 = arith.constant 2.000000e-01 : f32
    %20 = vector.broadcast %cst_14 : f32 to vector<16x16xf32>
    %21 = arith.mulf %20, %17 : vector<16x16xf32>
    %22 = arith.select %19, %17, %21 : vector<16x16xi1>, vector<16x16xf32>
    %23 = arith.addf %22, %5 : vector<16x16xf32>
    %cst_15 = arith.constant dense<0xFF800000> : vector<16xf32>
    %24 = vector.multi_reduction <maximumf>, %23, %cst_15 [1] : vector<16x16xf32> to vector<16xf32>
    %25 = vector.shape_cast %24 : vector<16xf32> to vector<16x1xf32>
    %26 = vector.broadcast %25 : vector<16x1xf32> to vector<16x16xf32>
    %27 = arith.subf %23, %26 : vector<16x16xf32>
    %28 = math.exp %27 : vector<16x16xf32>
    %cst_16 = arith.constant dense<0.000000e+00> : vector<16xf32>
    %29 = vector.multi_reduction <add>, %28, %cst_16 [1] : vector<16x16xf32> to vector<16xf32>
    %30 = vector.shape_cast %29 : vector<16xf32> to vector<16x1xf32>
    %31 = tpu.reciprocal %30 {approx = true} : vector<16x1xf32> -> vector<16x1xf32>
    %32 = vector.broadcast %31 : vector<16x1xf32> to vector<16x16xf32>
    %33 = arith.mulf %28, %32 : vector<16x16xf32>
    %34 = arith.truncf %33 : vector<16x16xf32> to vector<16x16xbf16>
    %35 = arith.truncf %12 : vector<16x32xf32> to vector<16x32xbf16>
    %cst_17 = arith.constant dense<0.000000e+00> : vector<16x32xf32>
    %36 = tpu.matmul %34, %35, %cst_17 {dimension_numbers = #tpu.dot_dimension_numbers<[1], [0], [0], [1], [0, 0, 1, 1], [], []>} : vector<16x16xbf16>, vector<16x32xbf16>, vector<16x32xf32> -> vector<16x32xf32>
    %37 = vector.broadcast %9 : vector<1x32xf32> to vector<16x32xf32>
    %38 = arith.addf %36, %37 : vector<16x32xf32>
    %c0_18 = arith.constant 0 : index
    %c0_19 = arith.constant 0 : index
    %c0_20 = arith.constant 0 : index
    %39 = vector.load %arg5[%c0_18, %c0_19, %c0_20] : memref<3x32x33xbf16, #tpu.memory_space<vmem>>, vector<1x32x33xbf16>
    %40 = vector.shape_cast %39 : vector<1x32x33xbf16> to vector<32x33xbf16>
    %c0_21 = arith.constant 0 : index
    %c0_22 = arith.constant 0 : index
    %c0_23 = arith.constant 0 : index
    %41 = vector.load %arg6[%c0_21, %c0_22, %c0_23] : memref<3x1x32xf32, #tpu.memory_space<vmem>>, vector<1x1x32xf32>
    %42 = vector.shape_cast %41 : vector<1x1x32xf32> to vector<1x32xf32>
    %c0_24 = arith.constant 0 : index
    %c0_25 = arith.constant 0 : index
    %c0_26 = arith.constant 0 : index
    %43 = vector.load %arg7[%c0_24, %c0_25, %c0_26] : memref<3x1x32xf32, #tpu.memory_space<vmem>>, vector<1x1x32xf32>
    %44 = vector.shape_cast %43 : vector<1x1x32xf32> to vector<1x32xf32>
    %45 = arith.truncf %38 : vector<16x32xf32> to vector<16x32xbf16>
    %cst_27 = arith.constant dense<0.000000e+00> : vector<16x33xf32>
    %46 = tpu.matmul %45, %40, %cst_27 {dimension_numbers = #tpu.dot_dimension_numbers<[1], [0], [0], [1], [0, 0, 1, 1], [], []>} : vector<16x32xbf16>, vector<32x33xbf16>, vector<16x33xf32> -> vector<16x33xf32>
    %47 = vector.extract_strided_slice %46 {offsets = [0, 0], sizes = [16, 32], strides = [1, 1]} : vector<16x33xf32> to vector<16x32xf32>
    %48 = vector.extract_strided_slice %46 {offsets = [0, 32], sizes = [16, 1], strides = [1, 1]} : vector<16x33xf32> to vector<16x1xf32>
    %cst_28 = arith.constant dense<0.000000e+00> : vector<1x16xf32>
    %49 = tpu.matmul %42, %47, %cst_28 {dimension_numbers = #tpu.dot_dimension_numbers<[1], [1], [0], [0], [0, 0, 1, 0], [], []>} : vector<1x32xf32>, vector<16x32xf32>, vector<1x16xf32> -> vector<1x16xf32>
    %50 = vector.broadcast %48 : vector<16x1xf32> to vector<16x16xf32>
    %51 = vector.broadcast %49 : vector<1x16xf32> to vector<16x16xf32>
    %52 = arith.addf %50, %51 : vector<16x16xf32>
    %cst_29 = arith.constant 0.000000e+00 : f32
    %53 = vector.broadcast %cst_29 : f32 to vector<16x16xf32>
    %54 = arith.cmpf ogt, %52, %53 : vector<16x16xf32>
    %cst_30 = arith.constant 2.000000e-01 : f32
    %55 = vector.broadcast %cst_30 : f32 to vector<16x16xf32>
    %56 = arith.mulf %55, %52 : vector<16x16xf32>
    %57 = arith.select %54, %52, %56 : vector<16x16xi1>, vector<16x16xf32>
    %58 = arith.addf %57, %5 : vector<16x16xf32>
    %cst_31 = arith.constant dense<0xFF800000> : vector<16xf32>
    %59 = vector.multi_reduction <maximumf>, %58, %cst_31 [1] : vector<16x16xf32> to vector<16xf32>
    %60 = vector.shape_cast %59 : vector<16xf32> to vector<16x1xf32>
    %61 = vector.broadcast %60 : vector<16x1xf32> to vector<16x16xf32>
    %62 = arith.subf %58, %61 : vector<16x16xf32>
    %63 = math.exp %62 : vector<16x16xf32>
    %cst_32 = arith.constant dense<0.000000e+00> : vector<16xf32>
    %64 = vector.multi_reduction <add>, %63, %cst_32 [1] : vector<16x16xf32> to vector<16xf32>
    %65 = vector.shape_cast %64 : vector<16xf32> to vector<16x1xf32>
    %66 = tpu.reciprocal %65 {approx = true} : vector<16x1xf32> -> vector<16x1xf32>
    %67 = vector.broadcast %66 : vector<16x1xf32> to vector<16x16xf32>
    %68 = arith.mulf %63, %67 : vector<16x16xf32>
    %69 = arith.truncf %68 : vector<16x16xf32> to vector<16x16xbf16>
    %70 = arith.truncf %47 : vector<16x32xf32> to vector<16x32xbf16>
    %cst_33 = arith.constant dense<0.000000e+00> : vector<16x32xf32>
    %71 = tpu.matmul %69, %70, %cst_33 {dimension_numbers = #tpu.dot_dimension_numbers<[1], [0], [0], [1], [0, 0, 1, 1], [], []>} : vector<16x16xbf16>, vector<16x32xbf16>, vector<16x32xf32> -> vector<16x32xf32>
    %72 = vector.broadcast %44 : vector<1x32xf32> to vector<16x32xf32>
    %73 = arith.addf %71, %72 : vector<16x32xf32>
    %cst_34 = arith.constant 0.000000e+00 : f32
    %74 = vector.broadcast %cst_34 : f32 to vector<16x32xf32>
    %75 = arith.maximumf %73, %74 : vector<16x32xf32>
    %c1 = arith.constant 1 : index
    %c0_35 = arith.constant 0 : index
    %c0_36 = arith.constant 0 : index
    %76 = vector.load %arg5[%c1, %c0_35, %c0_36] : memref<3x32x33xbf16, #tpu.memory_space<vmem>>, vector<1x32x33xbf16>
    %77 = vector.shape_cast %76 : vector<1x32x33xbf16> to vector<32x33xbf16>
    %c1_37 = arith.constant 1 : index
    %c0_38 = arith.constant 0 : index
    %c0_39 = arith.constant 0 : index
    %78 = vector.load %arg6[%c1_37, %c0_38, %c0_39] : memref<3x1x32xf32, #tpu.memory_space<vmem>>, vector<1x1x32xf32>
    %79 = vector.shape_cast %78 : vector<1x1x32xf32> to vector<1x32xf32>
    %c1_40 = arith.constant 1 : index
    %c0_41 = arith.constant 0 : index
    %c0_42 = arith.constant 0 : index
    %80 = vector.load %arg7[%c1_40, %c0_41, %c0_42] : memref<3x1x32xf32, #tpu.memory_space<vmem>>, vector<1x1x32xf32>
    %81 = vector.shape_cast %80 : vector<1x1x32xf32> to vector<1x32xf32>
    %82 = arith.truncf %75 : vector<16x32xf32> to vector<16x32xbf16>
    %cst_43 = arith.constant dense<0.000000e+00> : vector<16x33xf32>
    %83 = tpu.matmul %82, %77, %cst_43 {dimension_numbers = #tpu.dot_dimension_numbers<[1], [0], [0], [1], [0, 0, 1, 1], [], []>} : vector<16x32xbf16>, vector<32x33xbf16>, vector<16x33xf32> -> vector<16x33xf32>
    %84 = vector.extract_strided_slice %83 {offsets = [0, 0], sizes = [16, 32], strides = [1, 1]} : vector<16x33xf32> to vector<16x32xf32>
    %85 = vector.extract_strided_slice %83 {offsets = [0, 32], sizes = [16, 1], strides = [1, 1]} : vector<16x33xf32> to vector<16x1xf32>
    %cst_44 = arith.constant dense<0.000000e+00> : vector<1x16xf32>
    %86 = tpu.matmul %79, %84, %cst_44 {dimension_numbers = #tpu.dot_dimension_numbers<[1], [1], [0], [0], [0, 0, 1, 0], [], []>} : vector<1x32xf32>, vector<16x32xf32>, vector<1x16xf32> -> vector<1x16xf32>
    %87 = vector.broadcast %85 : vector<16x1xf32> to vector<16x16xf32>
    %88 = vector.broadcast %86 : vector<1x16xf32> to vector<16x16xf32>
    %89 = arith.addf %87, %88 : vector<16x16xf32>
    %cst_45 = arith.constant 0.000000e+00 : f32
    %90 = vector.broadcast %cst_45 : f32 to vector<16x16xf32>
    %91 = arith.cmpf ogt, %89, %90 : vector<16x16xf32>
    %cst_46 = arith.constant 2.000000e-01 : f32
    %92 = vector.broadcast %cst_46 : f32 to vector<16x16xf32>
    %93 = arith.mulf %92, %89 : vector<16x16xf32>
    %94 = arith.select %91, %89, %93 : vector<16x16xi1>, vector<16x16xf32>
    %95 = arith.addf %94, %5 : vector<16x16xf32>
    %cst_47 = arith.constant dense<0xFF800000> : vector<16xf32>
    %96 = vector.multi_reduction <maximumf>, %95, %cst_47 [1] : vector<16x16xf32> to vector<16xf32>
    %97 = vector.shape_cast %96 : vector<16xf32> to vector<16x1xf32>
    %98 = vector.broadcast %97 : vector<16x1xf32> to vector<16x16xf32>
    %99 = arith.subf %95, %98 : vector<16x16xf32>
    %100 = math.exp %99 : vector<16x16xf32>
    %cst_48 = arith.constant dense<0.000000e+00> : vector<16xf32>
    %101 = vector.multi_reduction <add>, %100, %cst_48 [1] : vector<16x16xf32> to vector<16xf32>
    %102 = vector.shape_cast %101 : vector<16xf32> to vector<16x1xf32>
    %103 = tpu.reciprocal %102 {approx = true} : vector<16x1xf32> -> vector<16x1xf32>
    %104 = vector.broadcast %103 : vector<16x1xf32> to vector<16x16xf32>
    %105 = arith.mulf %100, %104 : vector<16x16xf32>
    %106 = arith.truncf %105 : vector<16x16xf32> to vector<16x16xbf16>
    %107 = arith.truncf %84 : vector<16x32xf32> to vector<16x32xbf16>
    %cst_49 = arith.constant dense<0.000000e+00> : vector<16x32xf32>
    %108 = tpu.matmul %106, %107, %cst_49 {dimension_numbers = #tpu.dot_dimension_numbers<[1], [0], [0], [1], [0, 0, 1, 1], [], []>} : vector<16x16xbf16>, vector<16x32xbf16>, vector<16x32xf32> -> vector<16x32xf32>
    %109 = vector.broadcast %81 : vector<1x32xf32> to vector<16x32xf32>
    %110 = arith.addf %108, %109 : vector<16x32xf32>
    %cst_50 = arith.constant 0.000000e+00 : f32
    %111 = vector.broadcast %cst_50 : f32 to vector<16x32xf32>
    %112 = arith.maximumf %110, %111 : vector<16x32xf32>
    %c2 = arith.constant 2 : index
    %c0_51 = arith.constant 0 : index
    %c0_52 = arith.constant 0 : index
    %113 = vector.load %arg5[%c2, %c0_51, %c0_52] : memref<3x32x33xbf16, #tpu.memory_space<vmem>>, vector<1x32x33xbf16>
    %114 = vector.shape_cast %113 : vector<1x32x33xbf16> to vector<32x33xbf16>
    %c2_53 = arith.constant 2 : index
    %c0_54 = arith.constant 0 : index
    %c0_55 = arith.constant 0 : index
    %115 = vector.load %arg6[%c2_53, %c0_54, %c0_55] : memref<3x1x32xf32, #tpu.memory_space<vmem>>, vector<1x1x32xf32>
    %116 = vector.shape_cast %115 : vector<1x1x32xf32> to vector<1x32xf32>
    %c2_56 = arith.constant 2 : index
    %c0_57 = arith.constant 0 : index
    %c0_58 = arith.constant 0 : index
    %117 = vector.load %arg7[%c2_56, %c0_57, %c0_58] : memref<3x1x32xf32, #tpu.memory_space<vmem>>, vector<1x1x32xf32>
    %118 = vector.shape_cast %117 : vector<1x1x32xf32> to vector<1x32xf32>
    %119 = arith.truncf %112 : vector<16x32xf32> to vector<16x32xbf16>
    %cst_59 = arith.constant dense<0.000000e+00> : vector<16x33xf32>
    %120 = tpu.matmul %119, %114, %cst_59 {dimension_numbers = #tpu.dot_dimension_numbers<[1], [0], [0], [1], [0, 0, 1, 1], [], []>} : vector<16x32xbf16>, vector<32x33xbf16>, vector<16x33xf32> -> vector<16x33xf32>
    %121 = vector.extract_strided_slice %120 {offsets = [0, 0], sizes = [16, 32], strides = [1, 1]} : vector<16x33xf32> to vector<16x32xf32>
    %122 = vector.extract_strided_slice %120 {offsets = [0, 32], sizes = [16, 1], strides = [1, 1]} : vector<16x33xf32> to vector<16x1xf32>
    %cst_60 = arith.constant dense<0.000000e+00> : vector<1x16xf32>
    %123 = tpu.matmul %116, %121, %cst_60 {dimension_numbers = #tpu.dot_dimension_numbers<[1], [1], [0], [0], [0, 0, 1, 0], [], []>} : vector<1x32xf32>, vector<16x32xf32>, vector<1x16xf32> -> vector<1x16xf32>
    %124 = vector.broadcast %122 : vector<16x1xf32> to vector<16x16xf32>
    %125 = vector.broadcast %123 : vector<1x16xf32> to vector<16x16xf32>
    %126 = arith.addf %124, %125 : vector<16x16xf32>
    %cst_61 = arith.constant 0.000000e+00 : f32
    %127 = vector.broadcast %cst_61 : f32 to vector<16x16xf32>
    %128 = arith.cmpf ogt, %126, %127 : vector<16x16xf32>
    %cst_62 = arith.constant 2.000000e-01 : f32
    %129 = vector.broadcast %cst_62 : f32 to vector<16x16xf32>
    %130 = arith.mulf %129, %126 : vector<16x16xf32>
    %131 = arith.select %128, %126, %130 : vector<16x16xi1>, vector<16x16xf32>
    %132 = arith.addf %131, %5 : vector<16x16xf32>
    %cst_63 = arith.constant dense<0xFF800000> : vector<16xf32>
    %133 = vector.multi_reduction <maximumf>, %132, %cst_63 [1] : vector<16x16xf32> to vector<16xf32>
    %134 = vector.shape_cast %133 : vector<16xf32> to vector<16x1xf32>
    %135 = vector.broadcast %134 : vector<16x1xf32> to vector<16x16xf32>
    %136 = arith.subf %132, %135 : vector<16x16xf32>
    %137 = math.exp %136 : vector<16x16xf32>
    %cst_64 = arith.constant dense<0.000000e+00> : vector<16xf32>
    %138 = vector.multi_reduction <add>, %137, %cst_64 [1] : vector<16x16xf32> to vector<16xf32>
    %139 = vector.shape_cast %138 : vector<16xf32> to vector<16x1xf32>
    %140 = tpu.reciprocal %139 {approx = true} : vector<16x1xf32> -> vector<16x1xf32>
    %141 = vector.broadcast %140 : vector<16x1xf32> to vector<16x16xf32>
    %142 = arith.mulf %137, %141 : vector<16x16xf32>
    %143 = arith.truncf %142 : vector<16x16xf32> to vector<16x16xbf16>
    %144 = arith.truncf %121 : vector<16x32xf32> to vector<16x32xbf16>
    %cst_65 = arith.constant dense<0.000000e+00> : vector<16x32xf32>
    %145 = tpu.matmul %143, %144, %cst_65 {dimension_numbers = #tpu.dot_dimension_numbers<[1], [0], [0], [1], [0, 0, 1, 1], [], []>} : vector<16x16xbf16>, vector<16x32xbf16>, vector<16x32xf32> -> vector<16x32xf32>
    %146 = vector.broadcast %118 : vector<1x32xf32> to vector<16x32xf32>
    %147 = arith.addf %145, %146 : vector<16x32xf32>
    %cst_66 = arith.constant 0.000000e+00 : f32
    %148 = vector.broadcast %cst_66 : f32 to vector<16x32xf32>
    %149 = arith.maximumf %147, %148 : vector<16x32xf32>
    %150 = tpu.concatenate %38, %75, %112, %149 in 1 : vector<16x32xf32>, vector<16x32xf32>, vector<16x32xf32>, vector<16x32xf32> -> vector<16x128xf32>
    %cst_67 = arith.constant 5.65685415 : f32
    %151 = vector.broadcast %cst_67 : f32 to vector<16x128xf32>
    %152 = arith.mulf %150, %151 : vector<16x128xf32>
    %c0_68 = arith.constant 0 : index
    %c0_69 = arith.constant 0 : index
    %153 = vector.load %arg8[%c0_68, %c0_69] : memref<1x128xf32, #tpu.memory_space<vmem>>, vector<1x128xf32>
    %154 = vector.broadcast %153 : vector<1x128xf32> to vector<16x128xf32>
    %155 = arith.addf %152, %154 : vector<16x128xf32>
    %c0_70 = arith.constant 0 : index
    %c0_71 = arith.constant 0 : index
    %156 = vector.load %arg13[%c0_70, %c0_71] : memref<128x128xf32, #tpu.memory_space<vmem>>, vector<128x128xf32>
    %cst_72 = arith.constant dense<0.000000e+00> : vector<16x128xf32>
    %157 = tpu.matmul %155, %156, %cst_72 {dimension_numbers = #tpu.dot_dimension_numbers<[1], [0], [0], [1], [0, 0, 1, 1], [], []>} : vector<16x128xf32>, vector<128x128xf32>, vector<16x128xf32> -> vector<16x128xf32>
    %158 = arith.mulf %155, %155 : vector<16x128xf32>
    %c0_73 = arith.constant 0 : index
    %c0_74 = arith.constant 0 : index
    %159 = vector.load %arg13[%c0_73, %c0_74] : memref<128x128xf32, #tpu.memory_space<vmem>>, vector<128x128xf32>
    %cst_75 = arith.constant dense<0.000000e+00> : vector<16x128xf32>
    %160 = tpu.matmul %158, %159, %cst_75 {dimension_numbers = #tpu.dot_dimension_numbers<[1], [0], [0], [1], [0, 0, 1, 1], [], []>} : vector<16x128xf32>, vector<128x128xf32>, vector<16x128xf32> -> vector<16x128xf32>
    %161 = arith.mulf %157, %157 : vector<16x128xf32>
    %162 = arith.subf %160, %161 : vector<16x128xf32>
    %cst_76 = arith.constant 1.03225803 : f32
    %163 = vector.broadcast %cst_76 : f32 to vector<16x128xf32>
    %164 = arith.mulf %162, %163 : vector<16x128xf32>
    %cst_77 = arith.constant 0.000000e+00 : f32
    %165 = vector.broadcast %cst_77 : f32 to vector<16x128xf32>
    %166 = arith.maximumf %164, %165 : vector<16x128xf32>
    %167 = math.sqrt %166 : vector<16x128xf32>
    %c0_78 = arith.constant 0 : index
    %c0_79 = arith.constant 0 : index
    %168 = vector.load %arg9[%c0_78, %c0_79] : memref<1x128xf32, #tpu.memory_space<vmem>>, vector<1x128xf32>
    %169 = arith.subf %155, %157 : vector<16x128xf32>
    %170 = vector.broadcast %168 : vector<1x128xf32> to vector<16x128xf32>
    %171 = arith.mulf %170, %169 : vector<16x128xf32>
    %cst_80 = arith.constant 9.99999997E-7 : f32
    %172 = vector.broadcast %cst_80 : f32 to vector<16x128xf32>
    %173 = arith.addf %167, %172 : vector<16x128xf32>
    %174 = arith.divf %171, %173 : vector<16x128xf32>
    %c0_81 = arith.constant 0 : index
    %c0_82 = arith.constant 0 : index
    %175 = vector.load %arg10[%c0_81, %c0_82] : memref<1x128xf32, #tpu.memory_space<vmem>>, vector<1x128xf32>
    %176 = vector.broadcast %175 : vector<1x128xf32> to vector<16x128xf32>
    %177 = arith.addf %174, %176 : vector<16x128xf32>
    %178 = arith.truncf %177 : vector<16x128xf32> to vector<16x128xbf16>
    %c0_83 = arith.constant 0 : index
    %c0_84 = arith.constant 0 : index
    %179 = vector.load %arg14[%c0_83, %c0_84] : memref<128x384xbf16, #tpu.memory_space<vmem>>, vector<128x384xbf16>
    %cst_85 = arith.constant dense<0.000000e+00> : vector<16x384xf32>
    %180 = tpu.matmul %178, %179, %cst_85 {dimension_numbers = #tpu.dot_dimension_numbers<[1], [0], [0], [1], [0, 0, 1, 1], [], []>} : vector<16x128xbf16>, vector<128x384xbf16>, vector<16x384xf32> -> vector<16x384xf32>
    %c0_86 = arith.constant 0 : index
    %c0_87 = arith.constant 0 : index
    %181 = vector.load %arg15[%c0_86, %c0_87] : memref<1x384xf32, #tpu.memory_space<vmem>>, vector<1x384xf32>
    %182 = vector.broadcast %181 : vector<1x384xf32> to vector<16x384xf32>
    %183 = arith.addf %180, %182 : vector<16x384xf32>
    %184 = vector.extract_strided_slice %183 {offsets = [0, 0], sizes = [16, 128], strides = [1, 1]} : vector<16x384xf32> to vector<16x128xf32>
    %185 = vector.extract_strided_slice %183 {offsets = [0, 128], sizes = [16, 128], strides = [1, 1]} : vector<16x384xf32> to vector<16x128xf32>
    %186 = vector.extract_strided_slice %183 {offsets = [0, 256], sizes = [16, 128], strides = [1, 1]} : vector<16x384xf32> to vector<16x128xf32>
    %187 = arith.mulf %184, %185 : vector<16x128xf32>
    %c0_88 = arith.constant 0 : index
    %c0_89 = arith.constant 0 : index
    %c0_90 = arith.constant 0 : index
    %188 = vector.load %arg16[%c0_88, %c0_89, %c0_90] : memref<4x128x16xf32, #tpu.memory_space<vmem>>, vector<1x128x16xf32>
    %189 = vector.shape_cast %188 : vector<1x128x16xf32> to vector<128x16xf32>
    %cst_91 = arith.constant dense<0.000000e+00> : vector<16x16xf32>
    %190 = tpu.matmul %187, %189, %cst_91 {dimension_numbers = #tpu.dot_dimension_numbers<[1], [0], [0], [1], [0, 0, 1, 1], [], []>} : vector<16x128xf32>, vector<128x16xf32>, vector<16x16xf32> -> vector<16x16xf32>
    %191 = vector.extract_strided_slice %185 {offsets = [0, 96], sizes = [16, 32], strides = [1, 1]} : vector<16x128xf32> to vector<16x32xf32>
    %192 = vector.extract_strided_slice %185 {offsets = [0, 0], sizes = [16, 96], strides = [1, 1]} : vector<16x128xf32> to vector<16x96xf32>
    %193 = tpu.concatenate %191, %192 in 1 : vector<16x32xf32>, vector<16x96xf32> -> vector<16x128xf32>
    %194 = arith.mulf %184, %193 : vector<16x128xf32>
    %c1_92 = arith.constant 1 : index
    %c0_93 = arith.constant 0 : index
    %c0_94 = arith.constant 0 : index
    %195 = vector.load %arg16[%c1_92, %c0_93, %c0_94] : memref<4x128x16xf32, #tpu.memory_space<vmem>>, vector<1x128x16xf32>
    %196 = vector.shape_cast %195 : vector<1x128x16xf32> to vector<128x16xf32>
    %cst_95 = arith.constant dense<0.000000e+00> : vector<16x16xf32>
    %197 = tpu.matmul %194, %196, %cst_95 {dimension_numbers = #tpu.dot_dimension_numbers<[1], [0], [0], [1], [0, 0, 1, 1], [], []>} : vector<16x128xf32>, vector<128x16xf32>, vector<16x16xf32> -> vector<16x16xf32>
    %198 = arith.addf %190, %197 : vector<16x16xf32>
    %199 = vector.extract_strided_slice %185 {offsets = [0, 64], sizes = [16, 64], strides = [1, 1]} : vector<16x128xf32> to vector<16x64xf32>
    %200 = vector.extract_strided_slice %185 {offsets = [0, 0], sizes = [16, 64], strides = [1, 1]} : vector<16x128xf32> to vector<16x64xf32>
    %201 = tpu.concatenate %199, %200 in 1 : vector<16x64xf32>, vector<16x64xf32> -> vector<16x128xf32>
    %202 = arith.mulf %184, %201 : vector<16x128xf32>
    %c2_96 = arith.constant 2 : index
    %c0_97 = arith.constant 0 : index
    %c0_98 = arith.constant 0 : index
    %203 = vector.load %arg16[%c2_96, %c0_97, %c0_98] : memref<4x128x16xf32, #tpu.memory_space<vmem>>, vector<1x128x16xf32>
    %204 = vector.shape_cast %203 : vector<1x128x16xf32> to vector<128x16xf32>
    %cst_99 = arith.constant dense<0.000000e+00> : vector<16x16xf32>
    %205 = tpu.matmul %202, %204, %cst_99 {dimension_numbers = #tpu.dot_dimension_numbers<[1], [0], [0], [1], [0, 0, 1, 1], [], []>} : vector<16x128xf32>, vector<128x16xf32>, vector<16x16xf32> -> vector<16x16xf32>
    %206 = arith.addf %198, %205 : vector<16x16xf32>
    %207 = vector.extract_strided_slice %185 {offsets = [0, 32], sizes = [16, 96], strides = [1, 1]} : vector<16x128xf32> to vector<16x96xf32>
    %208 = vector.extract_strided_slice %185 {offsets = [0, 0], sizes = [16, 32], strides = [1, 1]} : vector<16x128xf32> to vector<16x32xf32>
    %209 = tpu.concatenate %207, %208 in 1 : vector<16x96xf32>, vector<16x32xf32> -> vector<16x128xf32>
    %210 = arith.mulf %184, %209 : vector<16x128xf32>
    %c3 = arith.constant 3 : index
    %c0_100 = arith.constant 0 : index
    %c0_101 = arith.constant 0 : index
    %211 = vector.load %arg16[%c3, %c0_100, %c0_101] : memref<4x128x16xf32, #tpu.memory_space<vmem>>, vector<1x128x16xf32>
    %212 = vector.shape_cast %211 : vector<1x128x16xf32> to vector<128x16xf32>
    %cst_102 = arith.constant dense<0.000000e+00> : vector<16x16xf32>
    %213 = tpu.matmul %210, %212, %cst_102 {dimension_numbers = #tpu.dot_dimension_numbers<[1], [0], [0], [1], [0, 0, 1, 1], [], []>} : vector<16x128xf32>, vector<128x16xf32>, vector<16x16xf32> -> vector<16x16xf32>
    %214 = arith.addf %206, %213 : vector<16x16xf32>
    %cst_103 = arith.constant dense<0xFF800000> : vector<16xf32>
    %215 = vector.multi_reduction <maximumf>, %214, %cst_103 [1] : vector<16x16xf32> to vector<16xf32>
    %216 = vector.shape_cast %215 : vector<16xf32> to vector<16x1xf32>
    %217 = vector.broadcast %216 : vector<16x1xf32> to vector<16x16xf32>
    %218 = arith.subf %214, %217 : vector<16x16xf32>
    %219 = math.exp %218 : vector<16x16xf32>
    %c0_104 = arith.constant 0 : index
    %c0_105 = arith.constant 0 : index
    %220 = vector.load %arg18[%c0_104, %c0_105] : memref<16x16xf32, #tpu.memory_space<vmem>>, vector<16x16xf32>
    %cst_106 = arith.constant dense<0.000000e+00> : vector<16x16xf32>
    %221 = tpu.matmul %219, %220, %cst_106 {dimension_numbers = #tpu.dot_dimension_numbers<[1], [0], [0], [1], [0, 0, 1, 1], [], []>} : vector<16x16xf32>, vector<16x16xf32>, vector<16x16xf32> -> vector<16x16xf32>
    %222 = tpu.reciprocal %221 {approx = true} : vector<16x16xf32> -> vector<16x16xf32>
    %223 = arith.mulf %219, %222 : vector<16x16xf32>
    %c0_107 = arith.constant 0 : index
    %c0_108 = arith.constant 0 : index
    %c0_109 = arith.constant 0 : index
    %224 = vector.load %arg17[%c0_107, %c0_108, %c0_109] : memref<4x16x128xf32, #tpu.memory_space<vmem>>, vector<1x16x128xf32>
    %225 = vector.shape_cast %224 : vector<1x16x128xf32> to vector<16x128xf32>
    %cst_110 = arith.constant dense<0.000000e+00> : vector<16x128xf32>
    %226 = tpu.matmul %223, %225, %cst_110 {dimension_numbers = #tpu.dot_dimension_numbers<[1], [0], [0], [1], [0, 0, 1, 1], [], []>} : vector<16x16xf32>, vector<16x128xf32>, vector<16x128xf32> -> vector<16x128xf32>
    %227 = arith.mulf %226, %186 : vector<16x128xf32>
    %c1_111 = arith.constant 1 : index
    %c0_112 = arith.constant 0 : index
    %c0_113 = arith.constant 0 : index
    %228 = vector.load %arg17[%c1_111, %c0_112, %c0_113] : memref<4x16x128xf32, #tpu.memory_space<vmem>>, vector<1x16x128xf32>
    %229 = vector.shape_cast %228 : vector<1x16x128xf32> to vector<16x128xf32>
    %cst_114 = arith.constant dense<0.000000e+00> : vector<16x128xf32>
    %230 = tpu.matmul %223, %229, %cst_114 {dimension_numbers = #tpu.dot_dimension_numbers<[1], [0], [0], [1], [0, 0, 1, 1], [], []>} : vector<16x16xf32>, vector<16x128xf32>, vector<16x128xf32> -> vector<16x128xf32>
    %231 = vector.extract_strided_slice %186 {offsets = [0, 96], sizes = [16, 32], strides = [1, 1]} : vector<16x128xf32> to vector<16x32xf32>
    %232 = vector.extract_strided_slice %186 {offsets = [0, 0], sizes = [16, 96], strides = [1, 1]} : vector<16x128xf32> to vector<16x96xf32>
    %233 = tpu.concatenate %231, %232 in 1 : vector<16x32xf32>, vector<16x96xf32> -> vector<16x128xf32>
    %234 = arith.mulf %230, %233 : vector<16x128xf32>
    %235 = arith.addf %227, %234 : vector<16x128xf32>
    %c2_115 = arith.constant 2 : index
    %c0_116 = arith.constant 0 : index
    %c0_117 = arith.constant 0 : index
    %236 = vector.load %arg17[%c2_115, %c0_116, %c0_117] : memref<4x16x128xf32, #tpu.memory_space<vmem>>, vector<1x16x128xf32>
    %237 = vector.shape_cast %236 : vector<1x16x128xf32> to vector<16x128xf32>
    %cst_118 = arith.constant dense<0.000000e+00> : vector<16x128xf32>
    %238 = tpu.matmul %223, %237, %cst_118 {dimension_numbers = #tpu.dot_dimension_numbers<[1], [0], [0], [1], [0, 0, 1, 1], [], []>} : vector<16x16xf32>, vector<16x128xf32>, vector<16x128xf32> -> vector<16x128xf32>
    %239 = vector.extract_strided_slice %186 {offsets = [0, 64], sizes = [16, 64], strides = [1, 1]} : vector<16x128xf32> to vector<16x64xf32>
    %240 = vector.extract_strided_slice %186 {offsets = [0, 0], sizes = [16, 64], strides = [1, 1]} : vector<16x128xf32> to vector<16x64xf32>
    %241 = tpu.concatenate %239, %240 in 1 : vector<16x64xf32>, vector<16x64xf32> -> vector<16x128xf32>
    %242 = arith.mulf %238, %241 : vector<16x128xf32>
    %243 = arith.addf %235, %242 : vector<16x128xf32>
    %c3_119 = arith.constant 3 : index
    %c0_120 = arith.constant 0 : index
    %c0_121 = arith.constant 0 : index
    %244 = vector.load %arg17[%c3_119, %c0_120, %c0_121] : memref<4x16x128xf32, #tpu.memory_space<vmem>>, vector<1x16x128xf32>
    %245 = vector.shape_cast %244 : vector<1x16x128xf32> to vector<16x128xf32>
    %cst_122 = arith.constant dense<0.000000e+00> : vector<16x128xf32>
    %246 = tpu.matmul %223, %245, %cst_122 {dimension_numbers = #tpu.dot_dimension_numbers<[1], [0], [0], [1], [0, 0, 1, 1], [], []>} : vector<16x16xf32>, vector<16x128xf32>, vector<16x128xf32> -> vector<16x128xf32>
    %247 = vector.extract_strided_slice %186 {offsets = [0, 32], sizes = [16, 96], strides = [1, 1]} : vector<16x128xf32> to vector<16x96xf32>
    %248 = vector.extract_strided_slice %186 {offsets = [0, 0], sizes = [16, 32], strides = [1, 1]} : vector<16x128xf32> to vector<16x32xf32>
    %249 = tpu.concatenate %247, %248 in 1 : vector<16x96xf32>, vector<16x32xf32> -> vector<16x128xf32>
    %250 = arith.mulf %246, %249 : vector<16x128xf32>
    %251 = arith.addf %243, %250 : vector<16x128xf32>
    %252 = arith.truncf %251 : vector<16x128xf32> to vector<16x128xbf16>
    %c0_123 = arith.constant 0 : index
    %c0_124 = arith.constant 0 : index
    %253 = vector.load %arg19[%c0_123, %c0_124] : memref<128x128xbf16, #tpu.memory_space<vmem>>, vector<128x128xbf16>
    %cst_125 = arith.constant dense<0.000000e+00> : vector<16x128xf32>
    %254 = tpu.matmul %252, %253, %cst_125 {dimension_numbers = #tpu.dot_dimension_numbers<[1], [0], [0], [1], [0, 0, 1, 1], [], []>} : vector<16x128xbf16>, vector<128x128xbf16>, vector<16x128xf32> -> vector<16x128xf32>
    %c0_126 = arith.constant 0 : index
    %c0_127 = arith.constant 0 : index
    %255 = vector.load %arg20[%c0_126, %c0_127] : memref<1x128xf32, #tpu.memory_space<vmem>>, vector<1x128xf32>
    %256 = vector.broadcast %255 : vector<1x128xf32> to vector<16x128xf32>
    %257 = arith.addf %254, %256 : vector<16x128xf32>
    %258 = arith.addf %155, %257 : vector<16x128xf32>
    %259 = vector.extract_strided_slice %258 {offsets = [0, 96], sizes = [16, 32], strides = [1, 1]} : vector<16x128xf32> to vector<16x32xf32>
    %cst_128 = arith.constant dense<0.000000e+00> : vector<16xf32>
    %260 = vector.multi_reduction <add>, %259, %cst_128 [1] : vector<16x32xf32> to vector<16xf32>
    %261 = vector.shape_cast %260 : vector<16xf32> to vector<16x1xf32>
    %cst_129 = arith.constant 3.200000e+01 : f32
    %262 = vector.broadcast %cst_129 : f32 to vector<16x1xf32>
    %263 = arith.divf %261, %262 : vector<16x1xf32>
    %264 = vector.broadcast %263 : vector<16x1xf32> to vector<16x32xf32>
    %265 = arith.subf %259, %264 : vector<16x32xf32>
    %266 = arith.mulf %265, %265 : vector<16x32xf32>
    %cst_130 = arith.constant dense<0.000000e+00> : vector<16xf32>
    %267 = vector.multi_reduction <add>, %266, %cst_130 [1] : vector<16x32xf32> to vector<16xf32>
    %268 = vector.shape_cast %267 : vector<16xf32> to vector<16x1xf32>
    %cst_131 = arith.constant 0.0322580636 : f32
    %269 = vector.broadcast %cst_131 : f32 to vector<16x1xf32>
    %270 = arith.mulf %268, %269 : vector<16x1xf32>
    %271 = math.sqrt %270 : vector<16x1xf32>
    %c0_132 = arith.constant 0 : index
    %c0_133 = arith.constant 0 : index
    %272 = vector.load %arg11[%c0_132, %c0_133] : memref<1x32xf32, #tpu.memory_space<vmem>>, vector<1x32xf32>
    %273 = vector.broadcast %272 : vector<1x32xf32> to vector<16x32xf32>
    %274 = arith.mulf %273, %265 : vector<16x32xf32>
    %cst_134 = arith.constant 9.99999997E-7 : f32
    %275 = vector.broadcast %cst_134 : f32 to vector<16x1xf32>
    %276 = arith.addf %271, %275 : vector<16x1xf32>
    %277 = vector.broadcast %276 : vector<16x1xf32> to vector<16x32xf32>
    %278 = arith.divf %274, %277 : vector<16x32xf32>
    %c0_135 = arith.constant 0 : index
    %c0_136 = arith.constant 0 : index
    %279 = vector.load %arg12[%c0_135, %c0_136] : memref<1x32xf32, #tpu.memory_space<vmem>>, vector<1x32xf32>
    %280 = vector.broadcast %279 : vector<1x32xf32> to vector<16x32xf32>
    %281 = arith.addf %278, %280 : vector<16x32xf32>
    %282 = arith.truncf %281 : vector<16x32xf32> to vector<16x32xbf16>
    %c0_137 = arith.constant 0 : index
    %c0_138 = arith.constant 0 : index
    %283 = vector.load %arg21[%c0_137, %c0_138] : memref<32x128xbf16, #tpu.memory_space<vmem>>, vector<32x128xbf16>
    %cst_139 = arith.constant dense<0.000000e+00> : vector<16x128xf32>
    %284 = tpu.matmul %282, %283, %cst_139 {dimension_numbers = #tpu.dot_dimension_numbers<[1], [0], [0], [1], [0, 0, 1, 1], [], []>} : vector<16x32xbf16>, vector<32x128xbf16>, vector<16x128xf32> -> vector<16x128xf32>
    %c0_140 = arith.constant 0 : index
    %c0_141 = arith.constant 0 : index
    %285 = vector.load %arg22[%c0_140, %c0_141] : memref<1x128xf32, #tpu.memory_space<vmem>>, vector<1x128xf32>
    %286 = vector.broadcast %285 : vector<1x128xf32> to vector<16x128xf32>
    %287 = arith.addf %284, %286 : vector<16x128xf32>
    %cst_142 = arith.constant 0.000000e+00 : f32
    %288 = vector.broadcast %cst_142 : f32 to vector<16x128xf32>
    %289 = arith.maximumf %287, %288 : vector<16x128xf32>
    %290 = arith.truncf %289 : vector<16x128xf32> to vector<16x128xbf16>
    %c0_143 = arith.constant 0 : index
    %c0_144 = arith.constant 0 : index
    %291 = vector.load %arg23[%c0_143, %c0_144] : memref<128x32xbf16, #tpu.memory_space<vmem>>, vector<128x32xbf16>
    %cst_145 = arith.constant dense<0.000000e+00> : vector<16x32xf32>
    %292 = tpu.matmul %290, %291, %cst_145 {dimension_numbers = #tpu.dot_dimension_numbers<[1], [0], [0], [1], [0, 0, 1, 1], [], []>} : vector<16x128xbf16>, vector<128x32xbf16>, vector<16x32xf32> -> vector<16x32xf32>
    %c0_146 = arith.constant 0 : index
    %c0_147 = arith.constant 0 : index
    %293 = vector.load %arg24[%c0_146, %c0_147] : memref<1x32xf32, #tpu.memory_space<vmem>>, vector<1x32xf32>
    %294 = vector.broadcast %293 : vector<1x32xf32> to vector<16x32xf32>
    %295 = arith.addf %292, %294 : vector<16x32xf32>
    %cst_148 = arith.constant 2.000000e+00 : f32
    %296 = vector.broadcast %cst_148 : f32 to vector<16x32xf32>
    %297 = arith.mulf %296, %295 : vector<16x32xf32>
    %298 = arith.addf %259, %297 : vector<16x32xf32>
    %c0_149 = arith.constant 0 : index
    %c0_150 = arith.constant 0 : index
    %299 = vector.load %arg25[%c0_149, %c0_150] : memref<32x6xf32, #tpu.memory_space<vmem>>, vector<32x6xf32>
    %cst_151 = arith.constant dense<0.000000e+00> : vector<16x6xf32>
    %300 = tpu.matmul %298, %299, %cst_151 {dimension_numbers = #tpu.dot_dimension_numbers<[1], [0], [0], [1], [0, 0, 1, 1], [], []>} : vector<16x32xf32>, vector<32x6xf32>, vector<16x6xf32> -> vector<16x6xf32>
    %c0_152 = arith.constant 0 : index
    %c0_153 = arith.constant 0 : index
    %301 = vector.load %arg26[%c0_152, %c0_153] : memref<1x6xf32, #tpu.memory_space<vmem>>, vector<1x6xf32>
    %302 = vector.broadcast %301 : vector<1x6xf32> to vector<16x6xf32>
    %303 = arith.addf %300, %302 : vector<16x6xf32>
    %cst_154 = arith.constant dense<0xFF800000> : vector<16xf32>
    %304 = vector.multi_reduction <maximumf>, %303, %cst_154 [1] : vector<16x6xf32> to vector<16xf32>
    %305 = vector.shape_cast %304 : vector<16xf32> to vector<16x1xf32>
    %306 = vector.broadcast %305 : vector<16x1xf32> to vector<16x6xf32>
    %307 = arith.subf %303, %306 : vector<16x6xf32>
    %308 = math.exp %307 : vector<16x6xf32>
    %cst_155 = arith.constant dense<0.000000e+00> : vector<16xf32>
    %309 = vector.multi_reduction <add>, %308, %cst_155 [1] : vector<16x6xf32> to vector<16xf32>
    %310 = vector.shape_cast %309 : vector<16xf32> to vector<16x1xf32>
    %311 = math.log %310 : vector<16x1xf32>
    %312 = vector.broadcast %311 : vector<16x1xf32> to vector<16x6xf32>
    %313 = arith.subf %307, %312 : vector<16x6xf32>
    %cst_156 = arith.constant 0.000000e+00 : f32
    %314 = vector.broadcast %cst_156 : f32 to vector<16x106xf32>
    %315 = tpu.concatenate %214, %313, %314 in 1 : vector<16x16xf32>, vector<16x6xf32>, vector<16x106xf32> -> vector<16x128xf32>
    %c0_157 = arith.constant 0 : index
    %c0_158 = arith.constant 0 : index
    %316 = vector.load %arg27[%c0_157, %c0_158] : memref<16x128xf32, #tpu.memory_space<vmem>>, vector<16x128xf32>
    tpu.vector_store %arg27[%c0_157, %c0_158], %315 {strides = array<i32>} : memref<16x128xf32, #tpu.memory_space<vmem>>, vector<16x128xf32>,
    return
  }
}

</mosaic_0001>

<bundles_post_ra>
// kernel: transf_enc_forward.1
= control target key start
LH: loop header
LB: loop body
LE: loop exit
PB: predicated region body
PF: predicated region fallthrough
CT: control target
= control target key end

     0   :  { %vm103_vm0 = vcmask 1043456   ;;  %v3846_v0 = vmov 0.0   ;;  %vm3847_vm1 = vmmov 0   ;;  %v3848_v6 = vmov 32   ;;  %s4786_s2 = inlined_call_operand.vmem [shape: bf16[8,33], index: 2, kind: input, shape index: {}]   ;;  %s4787_s0 = inlined_call_operand.vmem [shape: f32[16,8], index: 0, kind: input, shape index: {}]   ;;  %s4788_s3 = inlined_call_operand.vmem [shape: f32[1,32], index: 3, kind: input, shape index: {}]   ;;  %s4789_s1 = inlined_call_operand.vmem [shape: f32[16,16], index: 1, kind: input, shape index: {}]   ;;  %s4790_s5 = inlined_call_operand.vmem [shape: bf16[3,32,33], index: 5, kind: input, shape index: {}]   ;;  %s4791_s4 = inlined_call_operand.vmem [shape: f32[1,32], index: 4, kind: input, shape index: {}]   ;;  %s4792_s6 = inlined_call_operand.vmem [shape: f32[3,1,32], index: 6, kind: input, shape index: {}]   ;;  %s4793_s7 = inlined_call_operand.vmem [shape: f32[3,1,32], index: 7, kind: input, shape index: {}]   ;;  %s4794_s13 = inlined_call_operand.vmem [shape: f32[128,128], index: 13, kind: input, shape index: {}]   ;;  %s4795_s8 = inlined_call_operand.vmem [shape: f32[1,128], index: 8, kind: input, shape index: {}]   ;;  %s4796_s14 = inlined_call_operand.vmem [shape: bf16[128,384], index: 14, kind: input, shape index: {}]   ;;  %s4797_s16 = inlined_call_operand.vmem [shape: f32[4,128,16], index: 16, kind: input, shape index: {}]   ;;  %s4798_s9 = inlined_call_operand.vmem [shape: f32[1,128], index: 9, kind: input, shape index: {}]   ;;  %s4799_s10 = inlined_call_operand.vmem [shape: f32[1,128], index: 10, kind: input, shape index: {}]   ;;  %s4800_s15 = inlined_call_operand.vmem [shape: f32[1,384], index: 15, kind: input, shape index: {}]   ;;  %s4801_s18 = inlined_call_operand.vmem [shape: f32[16,16], index: 18, kind: input, shape index: {}]   ;;  %s4802_s17 = inlined_call_operand.vmem [shape: f32[4,16,128], index: 17, kind: input, shape index: {}]   ;;  %s4803_s19 = inlined_call_operand.vmem [shape: bf16[128,128], index: 19, kind: input, shape index: {}]   ;;  %s4804_s20 = inlined_call_operand.vmem [shape: f32[1,128], index: 20, kind: input, shape index: {}]   ;;  %s4805_s21 = inlined_call_operand.vmem [shape: bf16[32,128], index: 21, kind: input, shape index: {}]   ;;  %s4806_s23 = inlined_call_operand.vmem [shape: bf16[128,32], index: 23, kind: input, shape index: {}]   ;;  %s4807_s11 = inlined_call_operand.vmem [shape: f32[1,32], index: 11, kind: input, shape index: {}]   ;;  %s4808_s12 = inlined_call_operand.vmem [shape: f32[1,32], index: 12, kind: input, shape index: {}]   ;;  %s4809_s22 = inlined_call_operand.vmem [shape: f32[1,128], index: 22, kind: input, shape index: {}]   ;;  %s4810_s24 = inlined_call_operand.vmem [shape: f32[1,32], index: 24, kind: input, shape index: {}]   ;;  %s4811_s25 = inlined_call_operand.vmem [shape: f32[32,6], index: 25, kind: input, shape index: {}]   ;;  %s4812_s26 = inlined_call_operand.vmem [shape: f32[1,6], index: 26, kind: input, shape index: {}]   ;;  %s4813_s27 = inlined_call_operand.vmem [shape: f32[16,128], index: 27, kind: output, shape index: {}]  }
   0x1   :  { %4822 = sst [smem:[#allocation2_spill]] %s4786_s2  ;;  %3309 = vmatprep.subr.bf16.mxu0 %v3846_v0  ;;  %3311 = vmatprep.mubr.msk.bf16.mxu0 %vm3847_vm1, %v3846_v0  ;;  %vm99_vm2 = vcmask 64512   ;;  %vm148_vm3 = vcmask 261120   ;;  %v236_v13 = vlaneseq  ;;  %v3849_v25 = vmov -1e+30  }
   0x2   :  { %4823 = sst [smem:[#allocation3_spill]] %s4787_s0  ;;  %3724 = vset.pattern.permute.xlu0 %v3848_v6  ;;  %3315 = vmatprep.subr.mxu1 %v3846_v0  ;;  %vm250_vm8 = vcmask 130048   ;;  %vm1077_vm15 = vcmask 523264  }
   0x3   :  { %4824 = sst [smem:[#allocation4_spill]] %s4788_s3  ;;  %3319 = vmatprep.mubr.msk.f32.mxu1 %vm3847_vm1, %v3846_v0  ;;  %3725 = vset.pattern.permute.xlu1 %v3848_v6  ;;  %v4024_v14 = vshrl.u32 %v236_v13, 7 }
   0x4   :  { %4825 = sst [smem:[#allocation5_spill]] %s4789_s1 }
   0x5   :  { %4826 = sst [smem:[#allocation6_spill]] %s4790_s5  ;;  %v4027_v16 = vsub.s32 0, %v4024_v14 }
   0x6   :  { %4827 = sst [smem:[#allocation7_spill]] %s4791_s4 }
   0x7   :  { %4828 = sst [smem:[#allocation8_spill]] %s4792_s6 }
   0x8   :  { %4829 = sst [smem:[#allocation9_spill]] %s4793_s7  ;;  %s3851_s7 = smov 64  }
   0x9   :  { %4830 = sst [smem:[#allocation10_spill]] %s4794_s13 }
   0xa   :  { %4831 = sst [smem:[#allocation11_spill]] %s4795_s8 }
   0xb   :  { %4832 = sst [smem:[#allocation12_spill]] %s4796_s14 }
   0xc   :  { %4833 = sst [smem:[#allocation13_spill]] %s4797_s16 }
   0xd   :  { %s4834_s13 = sld [smem:[#allocation2_spill]] }
   0xe   :  { %s4835_s4 = sld [smem:[#allocation3_spill]] }
   0xf   :  { %s4836_s1 = sld [smem:[#allocation4_spill]] }
  0x10   :  { %s4837_s2 = sld [smem:[#allocation5_spill]] }
  0x11   :  { %s4838_s30 = sld [smem:[#allocation6_spill]] }
  0x12   :  { %s4839_s14 = sld [smem:[#allocation7_spill]] }
  0x13   :  { %v95_v1 = vld [vmem:[%s4834_s13] sm:$0xf]  ;;  %s4840_s6 = sld [smem:[#allocation8_spill]]  ;;  %s3852_s13 = smov 96  }
  0x14   :  { %v93_v2 = vld [vmem:[%s4835_s4] sm:$0xff]  ;;  %v94_v3 = vld [vmem:[%s4835_s4 + $0x8] sm:$0xff]  ;;  %v105_v4 = vsel %vm103_vm0, %v95_v1, 0  ;;  %s4841_s8 = sld [smem:[#allocation9_spill]]  ;;  %vm1080_vm0 = vcmask 785408  }
  0x15   :  { %v98_v5 = vpack.c.bf16 %v94_v3, %v93_v2  ;;  %3310 = vmatpush3.bf16.msra.mxu0 %v105_v4  ;;  %v96_v12 = vld [vmem:[%s4836_s1] sm:$0x1]  ;;  %s4842_s4 = sld [smem:[#allocation10_spill]] }
  0x16   :  { %3322 = vmatprep.subr.bf16.mxu0 %v3846_v0  ;;  %v87_v17 = vld [vmem:[%s4837_s2] sm:$0xff]  ;;  %v88_v20 = vld [vmem:[%s4837_s2 + $0x8] sm:$0xff]  ;;  %s4843_s28 = sld [smem:[#allocation11_spill]] }
  0x17   :  { %vm89_vm4 = vcmp.gt.f32.partialorder %v87_v17, 0.0  ;;  %vm90_vm5 = vcmp.gt.f32.partialorder %v88_v20, 0.0  ;;  %v3726_v53 = vld [vmem:[%s4838_s30 + $0x8] sm:$0xff]   ;;  %v3727_v54 = vld [vmem:[%s4838_s30] sm:$0xff]   ;;  %s4844_s29 = sld [smem:[#allocation12_spill]] }
  0x18   :  { %3312 = vmatmul.mubr.msk.bf16.vlgmr.msra.gmra.mxu0 %vm99_vm2, %v98_v5  ;;  %v4036_v26 = vsel %vm89_vm4, 0.0, %v3849_v25  ;;  %v4038_v30 = vsel %vm90_vm5, 0.0, %v3849_v25  ;;  %v2958_v56 = vld [vmem:[%s4839_s14] ss:$0 sm:$0xff]  ;;  %s4845_s3 = sld [smem:[#allocation13_spill]] }
  0x19   :  { %3324 = vmatprep.mubr.msk.bf16.mxu0 %vm3847_vm1, %v3846_v0  ;;  %v329_v4 = vld [vmem:[%s4840_s6] sm:$0x1] }
  0xd8   :  { %v141_v7 = vpop.f32.mrf.mxu0 }
  0xd9   :  { %229 = vperm.xlu0 %3724, %v141_v7  }
  0xda   :  { %v3313_v8 = vpop.f32.mrf.mxu0 }
  0xdc   :  { %v144_v9 = vpop.f32.mrf.mxu0 }
  0xdd   :  { %v274_v10 = vpack.c.bf16 %v144_v9, %v141_v7  ;;  %233 = vperm.xlu0 %3724, %v144_v9   ;;  %3316 = vmatpush3.xpose.msk.msra.mxu1 %vm148_vm3, %v144_v9 }
  0xde   :  { %v3314_v11 = vpop.f32.mrf.mxu0  ;;  %3317 = vmatprep.subr.mxu1 %v3846_v0 }
  0xdf   :  { %3323 = vmatpush3.bf16.msra.mxu0 %v274_v10 }
  0xe0   :  { %3336 = vmatprep.subr.mxu0 %v3846_v0 }
  0xe1   :  { %3318 = vmatpush3.xpose.msk.msra.mxu1 %vm148_vm3, %v141_v7 }
  0xe2   :  { %3328 = vmatprep.subr.bf16.mxu1 %v3846_v0 }
  0xe4   :  { %3320 = vmatmul.mubr.msk.f32.vlgmr.msra.gmra.mxu1 %vm148_vm3, %v96_v12 }
  0xe5   :  { %3332 = vmatprep.mubr.msk.bf16.mxu1 %vm3847_vm1, %v3846_v0  ;;  %3329 = vmatpush3.bf16.msra.mxu1 %v3726_v53 }
  0xe6   :  { %3330 = vmatprep.subr.bf16.mxu1 %v3846_v0 }
  0xe9   :  { %3331 = vmatpush3.bf16.msra.mxu1 %v3727_v54 }
  0xea   :  { %3349 = vmatprep.subr.bf16.mxu1 %v3846_v0 }
 0x154   :  { %v230_v15 = vpop.permute.xlu0 %229 }
 0x158   :  { %v234_v21 = vpop.permute.xlu0 %233 }
 0x1a4   :  { %v224_v18 = vpop.f32.mrf.mxu1 }
 0x1a5   :  { %v239_v19 = vrot.slane %v224_v18, %v4027_v16 }
 0x1a6   :  { %v3321_v22 = vpop.f32.mrf.mxu1 }
 0x1a7   :  { %v240_v23 = vadd.f32 %v239_v19, %v230_v15  ;;  %v241_v24 = vadd.f32 %v239_v19, %v234_v21 }
 0x1a9   :  { %v244_v27 = vmul.f32 0.2, %v240_v23  ;;  %v245_v28 = vmul.f32 0.2, %v241_v24  ;;  %vm242_vm6 = vcmp.gt.f32.partialorder %v240_v23, 0.0  ;;  %vm243_vm7 = vcmp.gt.f32.partialorder %v241_v24, 0.0 }
 0x1ab   :  { %v246_v29 = vsel %vm242_vm6, %v240_v23, %v244_v27  ;;  %v247_v31 = vsel %vm243_vm7, %v241_v24, %v245_v28 }
 0x1ac   :  { %v248_v32 = vadd.f32 %v246_v29, %v4036_v26  ;;  %v249_v34 = vadd.f32 %v247_v31, %v4038_v30 }
 0x1ae   :  { %v251_v33 = vsel %vm250_vm8, %v248_v32, -inf  ;;  %v254_v35 = vsel %vm250_vm8, %v249_v34, -inf }
 0x1af   :  { %252 = vmax.xlane.f32.xlu1 %v251_v33 }
 0x1b3   :  { %255 = vmax.xlane.f32.xlu1 %v254_v35 }
 0x238   :  { %v253_v36 = vpop.xlane.xlu1 %252 }
 0x239   :  { %v257_v37 = vsub.f32 %v248_v32, %v253_v36 }
 0x23b   :  { %v259_v38 = vmul.f32 1.442695, %v257_v37 }
 0x23c   :  { %v256_v39 = vpop.xlane.xlu1 %255 }
 0x23d   :  { %3782 = vpow2.f32 %v259_v38  ;;  %v258_v40 = vsub.f32 %v249_v34, %v256_v39 }
 0x23f   :  { %v261_v41 = vmul.f32 1.442695, %v258_v40 }
 0x241   :  { %3784 = vpow2.f32 %v261_v41 }
 0x24a   :  { %v3783_v42 = vpop.eup %3782 }
 0x24b   :  { %v263_v43 = vsel %vm250_vm8, %v3783_v42, 0.0 }
 0x24c   :  { %264 = vadd.xlane.f32.xlu0 %v263_v43  ;;  %v3729_v43 = vld [vmem:[%s4838_s30 + $0x10] sm:$0xff]  }
 0x24e   :  { %v3785_v44 = vpop.eup %3784 }
 0x24f   :  { %v266_v45 = vsel %vm250_vm8, %v3785_v44, 0.0 }
 0x250   :  { %267 = vadd.xlane.f32.xlu1 %v266_v45 }
 0x2d5   :  { %v265_v46 = vpop.xlane.xlu0 %264 }
 0x2d6   :  { %3786 = vrcp.f32 %v265_v46 }
 0x2d9   :  { %v268_v47 = vpop.xlane.xlu1 %267 }
 0x2da   :  { %3788 = vrcp.f32 %v268_v47 }
 0x2e3   :  { %v3787_v48 = vpop.eup %3786 }
 0x2e4   :  { %v271_v50 = vmul.f32 %v3787_v48, %v3783_v42  ;;  %v3728_v42 = vld [vmem:[%s4838_s30 + $0x18] sm:$0xff]  }
 0x2e7   :  { %v3789_v49 = vpop.eup %3788 }
 0x2e8   :  { %v272_v51 = vmul.f32 %v3789_v49, %v3785_v44  ;;  %v2966_v44 = vld [vmem:[%s4841_s8] ss:$0 sm:$0xff] }
 0x2ea   :  { %v273_v52 = vpack.c.bf16 %v272_v51, %v271_v50 }
 0x2ec   :  { %3325 = vmatmul.mubr.msk.bf16.vlgmr.msra.gmra.mxu0 %vm250_vm8, %v273_v52 }
 0x2ed   :  { %3340 = vmatprep.mubr.msk.f32.mxu0 %vm3847_vm1, %v3846_v0 }
 0x3ac   :  { %v318_v55 = vpop.f32.mrf.mxu0 }
 0x3ad   :  { %v4060_v59 = vadd.f32 %v2958_v56, %v318_v55 }
 0x3ae   :  { %v3326_v57 = vpop.f32.mrf.mxu0 }
 0x3b0   :  { %v321_v58 = vpop.f32.mrf.mxu0 }
 0x3b1   :  { %v4062_v60 = vadd.f32 %v2958_v56, %v321_v58 }
 0x3b2   :  { %v3327_v61 = vpop.f32.mrf.mxu0 }
 0x3b3   :  { %v331_v62 = vpack.c.bf16 %v4062_v60, %v4060_v59  ;;  %v2972_v61 = vld [vmem:[%s4840_s6 + $0x1] sm:$0x1] }
 0x3b5   :  { %3333 = vmatmul.mubr.msk.bf16.vlgmr.msra.gmra.mxu1 %vm148_vm3, %v331_v62 }
 0x3b6   :  { %3353 = vmatprep.mubr.msk.bf16.mxu1 %vm3847_vm1, %v3846_v0  ;;  %3350 = vmatpush3.bf16.msra.mxu1 %v3728_v42 }
 0x3b7   :  { %3351 = vmatprep.subr.bf16.mxu1 %v3846_v0 }
 0x3ba   :  { %3352 = vmatpush3.bf16.msra.mxu1 %v3729_v43 }
 0x3bb   :  { %3364 = vmatprep.subr.bf16.mxu1 %v3846_v0 }
 0x475   :  { %v381_v63 = vpop.f32.mrf.mxu1 }
 0x476   :  { %468 = vperm.xlu1 %3725, %v381_v63  }
 0x477   :  { %v3334_v1 = vpop.f32.mrf.mxu1 }
 0x479   :  { %v384_v2 = vpop.f32.mrf.mxu1 }
 0x47a   :  { %472 = vperm.xlu1 %3725, %v384_v2   ;;  %3337 = vmatpush3.xpose.msk.msra.mxu0 %vm148_vm3, %v384_v2  ;;  %v512_v5 = vpack.c.bf16 %v384_v2, %v381_v63 }
 0x47b   :  { %v3335_v3 = vpop.f32.mrf.mxu1  ;;  %3338 = vmatprep.subr.mxu0 %v3846_v0 }
 0x47e   :  { %3339 = vmatpush3.xpose.msk.msra.mxu0 %vm148_vm3, %v381_v63 }
 0x47f   :  { %3343 = vmatprep.subr.bf16.mxu0 %v3846_v0 }
 0x481   :  { %3341 = vmatmul.mubr.msk.f32.vlgmr.msra.gmra.mxu0 %vm148_vm3, %v329_v4 }
 0x482   :  { %3344 = vmatpush3.bf16.msra.mxu0 %v512_v5  ;;  %3345 = vmatprep.mubr.msk.bf16.mxu0 %vm3847_vm1, %v3846_v0 }
 0x483   :  { %3357 = vmatprep.subr.mxu0 %v3846_v0 }
 0x4f1   :  { %v469_v6 = vpop.permute.xlu1 %468 }
 0x4f5   :  { %v473_v9 = vpop.permute.xlu1 %472 }
 0x541   :  { %v463_v7 = vpop.f32.mrf.mxu0 }
 0x542   :  { %v478_v8 = vrot.slane %v463_v7, %v4027_v16 }
 0x543   :  { %v3342_v10 = vpop.f32.mrf.mxu0 }
 0x544   :  { %v479_v11 = vadd.f32 %v478_v8, %v469_v6  ;;  %v480_v12 = vadd.f32 %v478_v8, %v473_v9 }
 0x546   :  { %v483_v13 = vmul.f32 0.2, %v479_v11  ;;  %v484_v15 = vmul.f32 0.2, %v480_v12  ;;  %vm482_vm9 = vcmp.gt.f32.partialorder %v480_v12, 0.0  ;;  %vm481_vm10 = vcmp.gt.f32.partialorder %v479_v11, 0.0 }
 0x548   :  { %v486_v17 = vsel %vm482_vm9, %v480_v12, %v484_v15  ;;  %v485_v18 = vsel %vm481_vm10, %v479_v11, %v483_v13 }
 0x549   :  { %v488_v19 = vadd.f32 %v486_v17, %v4038_v30  ;;  %v487_v20 = vadd.f32 %v485_v18, %v4036_v26 }
 0x54b   :  { %v492_v21 = vsel %vm250_vm8, %v488_v19, -inf  ;;  %v489_v22 = vsel %vm250_vm8, %v487_v20, -inf }
 0x54c   :  { %493 = vmax.xlane.f32.xlu0 %v492_v21  ;;  %490 = vmax.xlane.f32.xlu1 %v489_v22 }
 0x5d5   :  { %v494_v23 = vpop.xlane.xlu0 %493  ;;  %v491_v24 = vpop.xlane.xlu1 %490 }
 0x5d6   :  { %v496_v25 = vsub.f32 %v488_v19, %v494_v23  ;;  %v495_v27 = vsub.f32 %v487_v20, %v491_v24 }
 0x5d8   :  { %v497_v28 = vmul.f32 1.442695, %v495_v27  ;;  %v499_v29 = vmul.f32 1.442695, %v496_v25 }
 0x5da   :  { %3790 = vpow2.f32 %v497_v28 }
 0x5db   :  { %3792 = vpow2.f32 %v499_v29 }
 0x5e7   :  { %v3791_v31 = vpop.eup %3790 }
 0x5e8   :  { %v501_v32 = vsel %vm250_vm8, %v3791_v31, 0.0  ;;  %v3793_v33 = vpop.eup %3792 }
 0x5e9   :  { %502 = vadd.xlane.f32.xlu0 %v501_v32  ;;  %v504_v34 = vsel %vm250_vm8, %v3793_v33, 0.0 }
 0x5ed   :  { %505 = vadd.xlane.f32.xlu0 %v504_v34 }
 0x672   :  { %v503_v35 = vpop.xlane.xlu0 %502 }
 0x673   :  { %3794 = vrcp.f32 %v503_v35  ;;  %v3730_v35 = vld [vmem:[%s4838_s30 + $0x28] sm:$0xff]  }
 0x676   :  { %v506_v36 = vpop.xlane.xlu0 %505 }
 0x677   :  { %3796 = vrcp.f32 %v506_v36  ;;  %v3731_v36 = vld [vmem:[%s4838_s30 + $0x20] sm:$0xff]  }
 0x680   :  { %v3795_v37 = vpop.eup %3794 }
 0x681   :  { %v509_v39 = vmul.f32 %v3795_v37, %v3791_v31  ;;  %v2980_v37 = vld [vmem:[%s4841_s8 + $0x1] ss:$0 sm:$0xff] }
 0x684   :  { %v3797_v38 = vpop.eup %3796 }
 0x685   :  { %v510_v40 = vmul.f32 %v3797_v38, %v3793_v33 }
 0x687   :  { %v511_v41 = vpack.c.bf16 %v510_v40, %v509_v39 }
 0x689   :  { %3346 = vmatmul.mubr.msk.bf16.vlgmr.msra.gmra.mxu0 %vm250_vm8, %v511_v41 }
 0x68a   :  { %3361 = vmatprep.mubr.msk.f32.mxu0 %vm3847_vm1, %v3846_v0 }
 0x749   :  { %v556_v45 = vpop.f32.mrf.mxu0 }
 0x74a   :  { %v4101_v47 = vadd.f32 %v2966_v44, %v556_v45 }
 0x74b   :  { %v3347_v46 = vpop.f32.mrf.mxu0 }
 0x74c   :  { %v563_v51 = vmax.f32 %v4101_v47, 0.0  ;;  %v1108_v47 = vld [vmem:[%s4842_s4 + $0x70] sm:$0xff] }
 0x74d   :  { %v559_v48 = vpop.f32.mrf.mxu0 }
 0x74e   :  { %v4103_v49 = vadd.f32 %v2966_v44, %v559_v48 }
 0x74f   :  { %v3348_v50 = vpop.f32.mrf.mxu0 }
 0x750   :  { %v564_v52 = vmax.f32 %v4103_v49, 0.0 }
 0x752   :  { %v574_v53 = vpack.c.bf16 %v564_v52, %v563_v51 }
 0x754   :  { %3354 = vmatmul.mubr.msk.bf16.vlgmr.msra.gmra.mxu1 %vm148_vm3, %v574_v53 }
 0x755   :  { %3366 = vmatprep.mubr.msk.bf16.mxu1 %vm3847_vm1, %v3846_v0 }
 0x814   :  { %v624_v54 = vpop.f32.mrf.mxu1 }
 0x815   :  { %711 = vperm.xlu0 %3724, %v624_v54  }
 0x816   :  { %v3355_v55 = vpop.f32.mrf.mxu1 }
 0x817   :  { %v2986_v55 = vld [vmem:[%s4840_s6 + $0x2] sm:$0x1]  ;;  %s3850_s6 = smov 32  }
 0x818   :  { %v627_v56 = vpop.f32.mrf.mxu1 }
 0x819   :  { %v755_v57 = vpack.c.bf16 %v627_v56, %v624_v54  ;;  %715 = vperm.xlu1 %3725, %v627_v56   ;;  %3358 = vmatpush3.xpose.msk.msra.mxu0 %vm148_vm3, %v627_v56 }
 0x81a   :  { %v3356_v58 = vpop.f32.mrf.mxu1  ;;  %3359 = vmatprep.subr.mxu0 %v3846_v0 }
 0x81b   :  { %3365 = vmatpush3.bf16.msra.mxu1 %v755_v57 }
 0x81c   :  { %3378 = vmatprep.subr.mxu1 %v3846_v0 }
 0x81d   :  { %3360 = vmatpush3.xpose.msk.msra.mxu0 %vm148_vm3, %v624_v54 }
 0x81e   :  { %3370 = vmatprep.subr.bf16.mxu0 %v3846_v0 }
 0x820   :  { %3362 = vmatmul.mubr.msk.f32.vlgmr.msra.gmra.mxu0 %vm148_vm3, %v2972_v61 }
 0x821   :  { %3374 = vmatprep.mubr.msk.bf16.mxu0 %vm3847_vm1, %v3846_v0  ;;  %3371 = vmatpush3.bf16.msra.mxu0 %v3730_v35  ;;  %v1100_v35 = vld [vmem:[%s4842_s4 + $0x30] sm:$0xff] }
 0x822   :  { %3372 = vmatprep.subr.bf16.mxu0 %v3846_v0 }
 0x825   :  { %3373 = vmatpush3.bf16.msra.mxu0 %v3731_v36  ;;  %v1099_v36 = vld [vmem:[%s4842_s4 + $0x28] sm:$0xff] }
 0x890   :  { %v712_v63 = vpop.permute.xlu0 %711 }
 0x894   :  { %v716_v2 = vpop.permute.xlu1 %715 }
 0x8e0   :  { %v706_v62 = vpop.f32.mrf.mxu0 }
 0x8e1   :  { %v721_v1 = vrot.slane %v706_v62, %v4027_v16 }
 0x8e2   :  { %v3363_v3 = vpop.f32.mrf.mxu0 }
 0x8e3   :  { %v722_v4 = vadd.f32 %v721_v1, %v712_v63  ;;  %v723_v5 = vadd.f32 %v721_v1, %v716_v2 }
 0x8e5   :  { %v726_v6 = vmul.f32 0.2, %v722_v4  ;;  %v727_v7 = vmul.f32 0.2, %v723_v5  ;;  %vm725_vm11 = vcmp.gt.f32.partialorder %v723_v5, 0.0  ;;  %vm724_vm12 = vcmp.gt.f32.partialorder %v722_v4, 0.0 }
 0x8e7   :  { %v729_v8 = vsel %vm725_vm11, %v723_v5, %v727_v7  ;;  %v728_v9 = vsel %vm724_vm12, %v722_v4, %v726_v6 }
 0x8e8   :  { %v731_v10 = vadd.f32 %v729_v8, %v4038_v30  ;;  %v730_v11 = vadd.f32 %v728_v9, %v4036_v26 }
 0x8ea   :  { %v735_v12 = vsel %vm250_vm8, %v731_v10, -inf  ;;  %v732_v13 = vsel %vm250_vm8, %v730_v11, -inf }
 0x8eb   :  { %736 = vmax.xlane.f32.xlu1 %v735_v12  ;;  %733 = vmax.xlane.f32.xlu0 %v732_v13 }
 0x974   :  { %v737_v15 = vpop.xlane.xlu1 %736  ;;  %v734_v17 = vpop.xlane.xlu0 %733 }
 0x975   :  { %v739_v18 = vsub.f32 %v731_v10, %v737_v15  ;;  %v738_v19 = vsub.f32 %v730_v11, %v734_v17 }
 0x977   :  { %v740_v20 = vmul.f32 1.442695, %v738_v19  ;;  %v742_v21 = vmul.f32 1.442695, %v739_v18 }
 0x979   :  { %3798 = vpow2.f32 %v740_v20 }
 0x97a   :  { %3800 = vpow2.f32 %v742_v21 }
 0x986   :  { %v3799_v22 = vpop.eup %3798 }
 0x987   :  { %v744_v23 = vsel %vm250_vm8, %v3799_v22, 0.0  ;;  %v3801_v24 = vpop.eup %3800 }
 0x988   :  { %745 = vadd.xlane.f32.xlu0 %v744_v23  ;;  %v747_v25 = vsel %vm250_vm8, %v3801_v24, 0.0 }
 0x98c   :  { %748 = vadd.xlane.f32.xlu0 %v747_v25 }
 0xa11   :  { %v746_v27 = vpop.xlane.xlu0 %745 }
 0xa12   :  { %3802 = vrcp.f32 %v746_v27  ;;  %v1109_v27 = vld [vmem:[%s4842_s4 + $0x78] sm:$0xff] }
 0xa13   :  { %3391 = vmatprep.subr.mxu0 %v1109_v27 }
 0xa15   :  { %v749_v28 = vpop.xlane.xlu0 %748 }
 0xa16   :  { %3804 = vrcp.f32 %v749_v28  ;;  %v1106_v28 = vld [vmem:[%s4842_s4 + $0x60] sm:$0xff] }
 0xa1f   :  { %v3803_v29 = vpop.eup %3802 }
 0xa20   :  { %v752_v32 = vmul.f32 %v3803_v29, %v3799_v22  ;;  %v1105_v29 = vld [vmem:[%s4842_s4 + $0x58] sm:$0xff] }
 0xa23   :  { %v3805_v31 = vpop.eup %3804 }
 0xa24   :  { %v753_v33 = vmul.f32 %v3805_v31, %v3801_v24  ;;  %v1104_v31 = vld [vmem:[%s4842_s4 + $0x50] sm:$0xff] }
 0xa26   :  { %v754_v34 = vpack.c.bf16 %v753_v33, %v752_v32  ;;  %v1103_v32 = vld [vmem:[%s4842_s4 + $0x48] sm:$0xff]  ;;  %v1102_v33 = vld [vmem:[%s4842_s4 + $0x40] sm:$0xff] }
 0xa28   :  { %3367 = vmatmul.mubr.msk.bf16.vlgmr.msra.gmra.mxu1 %vm250_vm8, %v754_v34  ;;  %v1101_v34 = vld [vmem:[%s4842_s4 + $0x38] sm:$0xff] }
 0xa29   :  { %3382 = vmatprep.mubr.msk.f32.mxu1 %vm3847_vm1, %v3846_v0 }
 0xae8   :  { %v799_v38 = vpop.f32.mrf.mxu1 }
 0xae9   :  { %v800_v40 = vadd.f32 %v2980_v37, %v799_v38  ;;  %v1097_v38 = vld [vmem:[%s4842_s4 + $0x18] sm:$0xff] }
 0xaea   :  { %v3368_v39 = vpop.f32.mrf.mxu1 }
 0xaeb   :  { %v806_v44 = vmax.f32 %v800_v40, 0.0  ;;  %v1096_v39 = vld [vmem:[%s4842_s4 + $0x10] sm:$0xff]  ;;  %v1095_v40 = vld [vmem:[%s4842_s4 + $0x8] sm:$0xff] }
 0xaec   :  { %v802_v41 = vpop.f32.mrf.mxu1 }
 0xaed   :  { %v803_v42 = vadd.f32 %v2980_v37, %v802_v41  ;;  %v1098_v37 = vld [vmem:[%s4842_s4 + $0x20] sm:$0xff] }
 0xaee   :  { %v3369_v43 = vpop.f32.mrf.mxu1  ;;  %v2994_v41 = vld [vmem:[%s4841_s8 + $0x2] ss:$0 sm:$0xff] }
 0xaef   :  { %v807_v45 = vmax.f32 %v803_v42, 0.0  ;;  %v1094_v42 = vld [vmem:[%s4842_s4] sm:$0xff] }
 0xaf1   :  { %v817_v46 = vpack.c.bf16 %v807_v45, %v806_v44 }
 0xaf3   :  { %3375 = vmatmul.mubr.msk.bf16.vlgmr.msra.gmra.mxu0 %vm148_vm3, %v817_v46 }
 0xaf4   :  { %3392 = vmatpush3.msra.mxu0 %v1109_v27 }
 0xaf5   :  { %3393 = vmatprep.subr.mxu0 %v1108_v47 }
 0xaf6   :  { %3394 = vmatpush3.msra.mxu0 %v1108_v47 }
 0xbb3   :  { %v867_v48 = vpop.f32.mrf.mxu0 }
 0xbb4   :  { %954 = vperm.xlu0 %3724, %v867_v48  }
 0xbb5   :  { %v3376_v50 = vpop.f32.mrf.mxu0 }
 0xbb7   :  { %v870_v53 = vpop.f32.mrf.mxu0 }
 0xbb8   :  { %958 = vperm.xlu1 %3725, %v870_v53   ;;  %3379 = vmatpush3.xpose.msk.msra.mxu1 %vm148_vm3, %v870_v53  ;;  %v998_v56 = vpack.c.bf16 %v870_v53, %v867_v48 }
 0xbb9   :  { %v3377_v54 = vpop.f32.mrf.mxu0  ;;  %3380 = vmatprep.subr.mxu1 %v3846_v0 }
 0xbbc   :  { %3381 = vmatpush3.xpose.msk.msra.mxu1 %vm148_vm3, %v867_v48 }
 0xbbd   :  { %3385 = vmatprep.subr.bf16.mxu1 %v3846_v0 }
 0xbbf   :  { %3383 = vmatmul.mubr.msk.f32.vlgmr.msra.gmra.mxu1 %vm148_vm3, %v2986_v55 }
 0xbc0   :  { %3386 = vmatpush3.bf16.msra.mxu1 %v998_v56  ;;  %3387 = vmatprep.mubr.msk.bf16.mxu1 %vm3847_vm1, %v3846_v0 }
 0xbc1   :  { %3426 = vmatprep.subr.mxu1 %v1109_v27 }
 0xc2f   :  { %v955_v58 = vpop.permute.xlu0 %954 }
 0xc33   :  { %v959_v62 = vpop.permute.xlu1 %958 }
 0xc7f   :  { %v949_v57 = vpop.f32.mrf.mxu1 }
 0xc80   :  { %v964_v61 = vrot.slane %v949_v57, %v4027_v16 }
 0xc81   :  { %v3384_v63 = vpop.f32.mrf.mxu1 }
 0xc82   :  { %v965_v1 = vadd.f32 %v964_v61, %v955_v58  ;;  %v966_v2 = vadd.f32 %v964_v61, %v959_v62 }
 0xc84   :  { %v969_v3 = vmul.f32 0.2, %v965_v1  ;;  %v970_v4 = vmul.f32 0.2, %v966_v2  ;;  %vm968_vm13 = vcmp.gt.f32.partialorder %v966_v2, 0.0  ;;  %vm967_vm14 = vcmp.gt.f32.partialorder %v965_v1, 0.0 }
 0xc86   :  { %v972_v5 = vsel %vm968_vm13, %v966_v2, %v970_v4  ;;  %v971_v6 = vsel %vm967_vm14, %v965_v1, %v969_v3  ;;  %v2996_v1 = vld [vmem:[%s4843_s28] ss:$0 sm:$0xff] }
 0xc87   :  { %v974_v7 = vadd.f32 %v972_v5, %v4038_v30  ;;  %v973_v8 = vadd.f32 %v971_v6, %v4036_v26 }
 0xc89   :  { %v978_v9 = vsel %vm250_vm8, %v974_v7, -inf  ;;  %v975_v10 = vsel %vm250_vm8, %v973_v8, -inf }
 0xc8a   :  { %979 = vmax.xlane.f32.xlu1 %v978_v9  ;;  %976 = vmax.xlane.f32.xlu0 %v975_v10 }
 0xc9b   :  { %1055 = vrot.lane.b32.xlu1 %v564_v52, %s3850_s6 }
 0xc9f   :  { %1061 = vrot.lane.b32.xlu1 %v806_v44, %s3851_s7 }
 0xd13   :  { %v980_v11 = vpop.xlane.xlu1 %979  ;;  %v977_v12 = vpop.xlane.xlu0 %976 }
 0xd14   :  { %v982_v13 = vsub.f32 %v974_v7, %v980_v11  ;;  %v981_v30 = vsub.f32 %v973_v8, %v977_v12  ;;  %v3732_v12 = vld [vmem:[%s4844_s29 + $0xa8] ss:$12 sps:$4 sm:$0xff]  }
 0xd16   :  { %v983_v15 = vmul.f32 1.442695, %v981_v30  ;;  %v985_v26 = vmul.f32 1.442695, %v982_v13  ;;  %v3735_v13 = vld [vmem:[%s4844_s29 + $0xb0] ss:$12 sps:$4 sm:$0xff]  }
 0xd17   :  { %v1056_v55 = vpop.permute.xlu1 %1055  ;;  %v3738_v30 = vld [vmem:[%s4844_s29 + $0x94] ss:$12 sps:$4 sm:$0xff]  }
 0xd18   :  { %3806 = vpow2.f32 %v983_v15  ;;  %v1076_v4 = vsel %vm148_vm3, %v4062_v60, %v1056_v55  ;;  %v3734_v60 = vld [vmem:[%s4844_s29 + $0xac] ss:$12 sps:$4 sm:$0xff]   ;;  %v3736_v15 = vld [vmem:[%s4844_s29 + $0x90] ss:$12 sps:$4 sm:$0xff]  }
 0xd19   :  { %3808 = vpow2.f32 %v985_v26  ;;  %v3739_v26 = vld [vmem:[%s4844_s29 + $0x98] ss:$12 sps:$4 sm:$0xff]  }
 0xd1b   :  { %v1062_v57 = vpop.permute.xlu1 %1061 }
 0xd25   :  { %v3807_v17 = vpop.eup %3806 }
 0xd26   :  { %v987_v18 = vsel %vm250_vm8, %v3807_v17, 0.0  ;;  %v3809_v19 = vpop.eup %3808 }
 0xd27   :  { %988 = vadd.xlane.f32.xlu0 %v987_v18  ;;  %v990_v20 = vsel %vm250_vm8, %v3809_v19, 0.0  ;;  %v3740_v18 = vld [vmem:[%s4844_s29 + $0x78] ss:$12 sps:$4 sm:$0xff]  }
 0xd2b   :  { %991 = vadd.xlane.f32.xlu0 %v990_v20  ;;  %v3746_v20 = vld [vmem:[%s4844_s29 + $0x64] ss:$12 sps:$4 sm:$0xff]  }
 0xd41   :  { %1053 = vrot.lane.b32.xlu0 %v563_v51, %s3850_s6  ;;  %v1107_v51 = vld [vmem:[%s4842_s4 + $0x68] sm:$0xff] }
 0xd42   :  { %3395 = vmatprep.subr.mxu0 %v1107_v51 }
 0xd43   :  { %3396 = vmatpush3.msra.mxu0 %v1107_v51 }
 0xd44   :  { %3397 = vmatprep.subr.mxu0 %v1106_v28 }
 0xd45   :  { %1063 = vrot.lane.b32.xlu0 %v807_v45, %s3851_s7  ;;  %3398 = vmatpush3.msra.mxu0 %v1106_v28 }
 0xd46   :  { %3399 = vmatprep.subr.mxu0 %v1105_v29 }
 0xd47   :  { %3400 = vmatpush3.msra.mxu0 %v1105_v29 }
 0xd48   :  { %3401 = vmatprep.subr.mxu0 %v1104_v31 }
 0xd49   :  { %3402 = vmatpush3.msra.mxu0 %v1104_v31 }
 0xd4a   :  { %3403 = vmatprep.subr.mxu0 %v1103_v32 }
 0xd4b   :  { %3404 = vmatpush3.msra.mxu0 %v1103_v32 }
 0xd4c   :  { %3405 = vmatprep.subr.mxu0 %v1102_v33 }
 0xd4d   :  { %3406 = vmatpush3.msra.mxu0 %v1102_v33 }
 0xd4e   :  { %3407 = vmatprep.subr.mxu0 %v1101_v34 }
 0xd4f   :  { %3408 = vmatpush3.msra.mxu0 %v1101_v34 }
 0xd50   :  { %3409 = vmatprep.subr.mxu0 %v1100_v35 }
 0xd51   :  { %3410 = vmatpush3.msra.mxu0 %v1100_v35 }
 0xd52   :  { %3411 = vmatprep.subr.mxu0 %v1099_v36 }
 0xd53   :  { %3412 = vmatpush3.msra.mxu0 %v1099_v36 }
 0xd54   :  { %3413 = vmatprep.subr.mxu0 %v1098_v37 }
 0xd55   :  { %3414 = vmatpush3.msra.mxu0 %v1098_v37 }
 0xd56   :  { %3415 = vmatprep.subr.mxu0 %v1097_v38 }
 0xd57   :  { %3416 = vmatpush3.msra.mxu0 %v1097_v38 }
 0xd58   :  { %3417 = vmatprep.subr.mxu0 %v1096_v39 }
 0xd59   :  { %3418 = vmatpush3.msra.mxu0 %v1096_v39 }
 0xd5a   :  { %3419 = vmatprep.subr.mxu0 %v1095_v40 }
 0xd5b   :  { %3420 = vmatpush3.msra.mxu0 %v1095_v40 }
 0xd5c   :  { %3421 = vmatprep.subr.mxu0 %v1094_v42 }
 0xd5d   :  { %3422 = vmatpush3.msra.mxu0 %v1094_v42 }
 0xd5e   :  { %1488 = vmatprep.subr.bf16.mxu0 %v3734_v60 }
 0xdb0   :  { %v989_v49 = vpop.xlane.xlu0 %988 }
 0xdb1   :  { %3810 = vrcp.f32 %v989_v49  ;;  %v3744_v49 = vld [vmem:[%s4844_s29 + $0x60] ss:$12 sps:$4 sm:$0xff]  }
 0xdb4   :  { %v992_v52 = vpop.xlane.xlu0 %991 }
 0xdb5   :  { %3812 = vrcp.f32 %v992_v52  ;;  %v3747_v52 = vld [vmem:[%s4844_s29 + $0x68] ss:$12 sps:$4 sm:$0xff]  }
 0xdb8   :  { %v1054_v56 = vpop.permute.xlu0 %1053 }
 0xdb9   :  { %v1075_v58 = vsel %vm148_vm3, %v4060_v59, %v1054_v56 }
 0xdba   :  { %v1078_v62 = vsel %vm1077_vm15, %v1075_v58, %v1062_v57 }
 0xdbc   :  { %v1064_v61 = vpop.permute.xlu0 %1063 }
 0xdbd   :  { %v1079_v5 = vsel %vm1077_vm15, %v1076_v4, %v1064_v61 }
 0xdbe   :  { %v3811_v21 = vpop.eup %3810 }
 0xdbf   :  { %v995_v23 = vmul.f32 %v3811_v21, %v3807_v17  ;;  %v3742_v17 = vld [vmem:[%s4844_s29 + $0x7c] ss:$12 sps:$4 sm:$0xff]   ;;  %v3750_v21 = vld [vmem:[%s4844_s29 + $0x4c] ss:$12 sps:$4 sm:$0xff]  }
 0xdc2   :  { %v3813_v22 = vpop.eup %3812 }
 0xdc3   :  { %v996_v24 = vmul.f32 %v3813_v22, %v3809_v19  ;;  %v3743_v19 = vld [vmem:[%s4844_s29 + $0x80] ss:$12 sps:$4 sm:$0xff]   ;;  %v3748_v22 = vld [vmem:[%s4844_s29 + $0x48] ss:$12 sps:$4 sm:$0xff]  }
 0xdc5   :  { %v997_v25 = vpack.c.bf16 %v996_v24, %v995_v23  ;;  %v3751_v23 = vld [vmem:[%s4844_s29 + $0x50] ss:$12 sps:$4 sm:$0xff]   ;;  %v3754_v24 = vld [vmem:[%s4844_s29 + $0x34] ss:$12 sps:$4 sm:$0xff]  }
 0xdc7   :  { %3388 = vmatmul.mubr.msk.bf16.vlgmr.msra.gmra.mxu1 %vm250_vm8, %v997_v25  ;;  %v3752_v25 = vld [vmem:[%s4844_s29 + $0x30] ss:$12 sps:$4 sm:$0xff]  }
 0xdc8   :  { %3427 = vmatpush3.msra.mxu1 %v1109_v27  ;;  %v3853_v27 = vmov 0  }
 0xdc9   :  { %3428 = vmatprep.subr.mxu1 %v1108_v47 }
 0xdca   :  { %3429 = vmatpush3.msra.mxu1 %v1108_v47  ;;  %v3755_v47 = vld [vmem:[%s4844_s29 + $0x38] ss:$12 sps:$4 sm:$0xff]  }
 0xdcb   :  { %3430 = vmatprep.subr.mxu1 %v1107_v51 }
 0xdcc   :  { %3431 = vmatpush3.msra.mxu1 %v1107_v51  ;;  %v3758_v51 = vld [vmem:[%s4844_s29 + $0x1c] ss:$12 sps:$4 sm:$0xff]  }
 0xdcd   :  { %3432 = vmatprep.subr.mxu1 %v1106_v28 }
 0xdce   :  { %3433 = vmatpush3.msra.mxu1 %v1106_v28  ;;  %v3756_v28 = vld [vmem:[%s4844_s29 + $0x18] ss:$12 sps:$4 sm:$0xff]  }
 0xdcf   :  { %3434 = vmatprep.subr.mxu1 %v1105_v29 }
 0xdd0   :  { %3435 = vmatpush3.msra.mxu1 %v1105_v29  ;;  %v3759_v29 = vld [vmem:[%s4844_s29 + $0x20] ss:$12 sps:$4 sm:$0xff]  }
 0xdd1   :  { %3436 = vmatprep.subr.mxu1 %v1104_v31 }
 0xdd2   :  { %3437 = vmatpush3.msra.mxu1 %v1104_v31  ;;  %v3762_v31 = vld [vmem:[%s4844_s29 + $0x4] ss:$12 sps:$4 sm:$0xff]  }
 0xdd3   :  { %3438 = vmatprep.subr.mxu1 %v1103_v32 }
 0xdd4   :  { %3439 = vmatpush3.msra.mxu1 %v1103_v32  ;;  %v3760_v32 = vld [vmem:[%s4844_s29] ss:$12 sps:$4 sm:$0xff]  }
 0xdd5   :  { %3440 = vmatprep.subr.mxu1 %v1102_v33 }
 0xdd6   :  { %3441 = vmatpush3.msra.mxu1 %v1102_v33  ;;  %v3763_v33 = vld [vmem:[%s4844_s29 + $0x8] ss:$12 sps:$4 sm:$0xff]  }
 0xdd7   :  { %3442 = vmatprep.subr.mxu1 %v1101_v34 }
 0xdd8   :  { %3443 = vmatpush3.msra.mxu1 %v1101_v34  ;;  %v1589_v34 = vld [vmem:[%s4845_s3 + $0x78] sm:$0xff] }
 0xdd9   :  { %3444 = vmatprep.subr.mxu1 %v1100_v35 }
 0xdda   :  { %3445 = vmatpush3.msra.mxu1 %v1100_v35 }
 0xddb   :  { %3446 = vmatprep.subr.mxu1 %v1099_v36 }
 0xddc   :  { %3447 = vmatpush3.msra.mxu1 %v1099_v36 }
 0xddd   :  { %3448 = vmatprep.subr.mxu1 %v1098_v37 }
 0xdde   :  { %3449 = vmatpush3.msra.mxu1 %v1098_v37 }
 0xddf   :  { %3450 = vmatprep.subr.mxu1 %v1097_v38 }
 0xde0   :  { %3451 = vmatpush3.msra.mxu1 %v1097_v38 }
 0xde1   :  { %3452 = vmatprep.subr.mxu1 %v1096_v39 }
 0xde2   :  { %3453 = vmatpush3.msra.mxu1 %v1096_v39 }
 0xde3   :  { %3454 = vmatprep.subr.mxu1 %v1095_v40 }
 0xde4   :  { %3455 = vmatpush3.msra.mxu1 %v1095_v40 }
 0xde5   :  { %3456 = vmatprep.subr.mxu1 %v1094_v42 }
 0xde6   :  { %3457 = vmatpush3.msra.mxu1 %v1094_v42 }
 0xde7   :  { %3461 = vmatprep.subr.bf16.mxu1 %v3846_v0 }
 0xe87   :  { %v1042_v43 = vpop.f32.mrf.mxu1 }
 0xe88   :  { %v1043_v44 = vadd.f32 %v2994_v41, %v1042_v43 }
 0xe89   :  { %v3389_v45 = vpop.f32.mrf.mxu1 }
 0xe8a   :  { %v1049_v46 = vmax.f32 %v1043_v44, 0.0 }
 0xe8b   :  { %v1045_v48 = vpop.f32.mrf.mxu1 }
 0xe8c   :  { %v1046_v50 = vadd.f32 %v2994_v41, %v1045_v48  ;;  %1069 = vrot.lane.b32.xlu1 %v1049_v46, %s3852_s13 }
 0xe8d   :  { %v3390_v53 = vpop.f32.mrf.mxu1 }
 0xe8e   :  { %v1050_v54 = vmax.f32 %v1046_v50, 0.0 }
 0xe90   :  { %1071 = vrot.lane.b32.xlu0 %v1050_v54, %s3852_s13 }
 0xefe   :  { %v1070_v63 = vpop.permute.xlu1 %1069 }
 0xeff   :  { %v1081_v2 = vsel %vm1080_vm0, %v1078_v62, %v1070_v63 }
 0xf00   :  { %v1083_v3 = vmul.f32 5.656854, %v1081_v2 }
 0xf02   :  { %v4233_v6 = vadd.f32 %v2996_v1, %v1083_v3  ;;  %v1072_v7 = vpop.permute.xlu0 %1071  ;;  %v2997_v3 = vld [vmem:[%s4798_s9] ss:$0 sm:$0xff] }
 0xf03   :  { %v1082_v8 = vsel %vm1080_vm0, %v1079_v5, %v1072_v7 }
 0xf04   :  { %v1084_v59 = vmul.f32 5.656854, %v1082_v8  ;;  %3423 = vmatprep.mubr.f32.mxu0 %v4233_v6  ;;  %v1185_v9 = vmul.f32 %v4233_v6, %v4233_v6 }
 0xf06   :  { %v4238_v10 = vadd.f32 %v2996_v1, %v1084_v59  ;;  %3458 = vmatprep.mubr.f32.mxu1 %v1185_v9 }
 0xf08   :  { %3424 = vmatmul.mubr.f32.vlgmr.msra.gmra.mxu0 %v4238_v10  ;;  %v1186_v11 = vmul.f32 %v4238_v10, %v4238_v10 }
 0xf09   :  { %1489 = vmatpush1.bf16.msra.mxu0 %v3732_v12  ;;  %1520 = vmatprep.mubr.bf16.mxu0 %v3853_v27  ;;  %v1575_v27 = vld [vmem:[%s4845_s3 + $0x8] sm:$0xff] }
 0xf0a   :  { %3459 = vmatmul.mubr.f32.vlgmr.msra.gmra.mxu1 %v1186_v11  ;;  %1490 = vmatprep.subr.bf16.mxu0 %v3738_v30  ;;  %v2998_v11 = vld [vmem:[%s4799_s10] ss:$0 sm:$0xff] }
 0xf0b   :  { %3477 = vmatprep.mubr.msk.bf16.mxu1 %vm3847_vm1, %v3846_v0  ;;  %3462 = vmatpush3.bf16.msra.mxu1 %v3735_v13 }
 0xf0c   :  { %3463 = vmatprep.subr.bf16.mxu1 %v3846_v0 }
 0xf0d   :  { %1491 = vmatpush1.bf16.msra.mxu0 %v3736_v15  ;;  %v1588_v15 = vld [vmem:[%s4845_s3 + $0x70] sm:$0xff] }
 0xf0e   :  { %1492 = vmatprep.subr.bf16.mxu0 %v3742_v17  ;;  %v1586_v17 = vld [vmem:[%s4845_s3 + $0x60] sm:$0xff] }
 0xf0f   :  { %3464 = vmatpush3.bf16.msra.mxu1 %v3739_v26  ;;  %v1587_v26 = vld [vmem:[%s4845_s3 + $0x68] sm:$0xff] }
 0xf10   :  { %3465 = vmatprep.subr.bf16.mxu1 %v3846_v0 }
 0xf11   :  { %1493 = vmatpush1.bf16.msra.mxu0 %v3740_v18  ;;  %v1585_v18 = vld [vmem:[%s4845_s3 + $0x58] sm:$0xff] }
 0xf12   :  { %1494 = vmatprep.subr.bf16.mxu0 %v3746_v20  ;;  %v1583_v20 = vld [vmem:[%s4845_s3 + $0x48] sm:$0xff] }
 0xf13   :  { %3466 = vmatpush3.bf16.msra.mxu1 %v3743_v19  ;;  %v1584_v19 = vld [vmem:[%s4845_s3 + $0x50] sm:$0xff] }
 0xf14   :  { %3467 = vmatprep.subr.bf16.mxu1 %v3846_v0 }
 0xf15   :  { %1495 = vmatpush1.bf16.msra.mxu0 %v3744_v49  ;;  %v1582_v49 = vld [vmem:[%s4845_s3 + $0x40] sm:$0xff] }
 0xf16   :  { %1496 = vmatprep.subr.bf16.mxu0 %v3750_v21  ;;  %v1580_v21 = vld [vmem:[%s4845_s3 + $0x30] sm:$0xff] }
 0xf17   :  { %3468 = vmatpush3.bf16.msra.mxu1 %v3747_v52  ;;  %v1581_v52 = vld [vmem:[%s4845_s3 + $0x38] sm:$0xff] }
 0xf18   :  { %3469 = vmatprep.subr.bf16.mxu1 %v3846_v0 }
 0xf19   :  { %1497 = vmatpush1.bf16.msra.mxu0 %v3748_v22  ;;  %v1579_v22 = vld [vmem:[%s4845_s3 + $0x28] sm:$0xff] }
 0xf1a   :  { %1498 = vmatprep.subr.bf16.mxu0 %v3754_v24  ;;  %v1577_v24 = vld [vmem:[%s4845_s3 + $0x18] sm:$0xff] }
 0xf1b   :  { %3470 = vmatpush3.bf16.msra.mxu1 %v3751_v23  ;;  %v1578_v23 = vld [vmem:[%s4845_s3 + $0x20] sm:$0xff] }
 0xf1c   :  { %3471 = vmatprep.subr.bf16.mxu1 %v3846_v0 }
 0xf1d   :  { %1499 = vmatpush1.bf16.msra.mxu0 %v3752_v25  ;;  %v1576_v25 = vld [vmem:[%s4845_s3 + $0x10] sm:$0xff] }
 0xf1e   :  { %1500 = vmatprep.subr.bf16.mxu0 %v3758_v51  ;;  %v3038_v51 = vld [vmem:[%s4845_s3 + $0xf8] sm:$0xff] }
 0xf1f   :  { %3472 = vmatpush3.bf16.msra.mxu1 %v3755_v47  ;;  %v1574_v47 = vld [vmem:[%s4845_s3] sm:$0xff] }
 0xf20   :  { %3473 = vmatprep.subr.bf16.mxu1 %v3846_v0 }
 0xf21   :  { %1501 = vmatpush1.bf16.msra.mxu0 %v3756_v28  ;;  %v3037_v28 = vld [vmem:[%s4845_s3 + $0xf0] sm:$0xff] }
 0xf22   :  { %1502 = vmatprep.subr.bf16.mxu0 %v3762_v31  ;;  %v3036_v31 = vld [vmem:[%s4845_s3 + $0xe8] sm:$0xff] }
 0xf23   :  { %3474 = vmatpush3.bf16.msra.mxu1 %v3759_v29  ;;  %v4389_v29 = vld [vmem:[%s4845_s3 + $0x1f8] sm:$0xff] }
 0xf24   :  { %3475 = vmatprep.subr.bf16.mxu1 %v3846_v0 }
 0xf25   :  { %1503 = vmatpush1.bf16.msra.mxu0 %v3760_v32  ;;  %v3035_v32 = vld [vmem:[%s4845_s3 + $0xe0] sm:$0xff] }
 0xf26   :  { %3481 = vmatprep.subr.mxu0 %v3038_v51 }
 0xf27   :  { %3476 = vmatpush3.bf16.msra.mxu1 %v3763_v33  ;;  %v3034_v33 = vld [vmem:[%s4845_s3 + $0xd8] sm:$0xff] }
 0xf28   :  { %3516 = vmatprep.subr.mxu1 %v1589_v34 }
 0xfc8   :  { %v3425_v35 = vpop.f32.mrf.mxu0 }
 0xfc9   :  { %v1263_v36 = vmul.f32 %v3425_v35, %v3425_v35  ;;  %v1286_v2 = vsub.f32 %v4238_v10, %v3425_v35  ;;  %v3032_v35 = vld [vmem:[%s4845_s3 + $0xc8] sm:$0xff] }
 0xfca   :  { %v1176_v37 = vpop.f32.mrf.mxu0  ;;  %v3460_v38 = vpop.f32.mrf.mxu1 }
 0xfcb   :  { %v1262_v39 = vmul.f32 %v1176_v37, %v1176_v37  ;;  %v1265_v40 = vsub.f32 %v3460_v38, %v1263_v36  ;;  %v1285_v4 = vsub.f32 %v4233_v6, %v1176_v37  ;;  %v1294_v7 = vmul.f32 %v2997_v3, %v1286_v2  ;;  %v3031_v36 = vld [vmem:[%s4845_s3 + $0xc0] sm:$0xff]  ;;  %v3030_v37 = vld [vmem:[%s4845_s3 + $0xb8] sm:$0xff]  ;;  %v3029_v38 = vld [vmem:[%s4845_s3 + $0xb0] sm:$0xff] }
 0xfcc   :  { %v1253_v41 = vpop.f32.mrf.mxu1 }
 0xfcd   :  { %v1267_v42 = vmul.f32 1.032258, %v1265_v40  ;;  %v1264_v43 = vsub.f32 %v1253_v41, %v1262_v39  ;;  %v1293_v8 = vmul.f32 %v2997_v3, %v1285_v4  ;;  %v3028_v39 = vld [vmem:[%s4845_s3 + $0xa8] sm:$0xff]  ;;  %v3027_v40 = vld [vmem:[%s4845_s3 + $0xa0] sm:$0xff]  ;;  %v3026_v41 = vld [vmem:[%s4845_s3 + $0x98] sm:$0xff] }
 0xfcf   :  { %v1269_v44 = vmax.f32 %v1267_v42, 0.0  ;;  %v1266_v45 = vmul.f32 1.032258, %v1264_v43  ;;  %v3025_v42 = vld [vmem:[%s4845_s3 + $0x90] sm:$0xff]  ;;  %v3024_v43 = vld [vmem:[%s4845_s3 + $0x88] sm:$0xff] }
 0xfd1   :  { %3814 = vrsqrt.f32 %v1269_v44  ;;  %v1268_v46 = vmax.f32 %v1266_v45, 0.0  ;;  %vm1279_vm2 = vcmp.eq.f32.partialorder %v1269_v44, inf  ;;  %v1282_v53 = vand.u32 2147483648, %v1269_v44 }
 0xfd2   :  { %vm1281_vm4 = vcmp.eq.f32.partialorder %v1269_v44, 0.0  ;;  %v1351_v45 = vsub.s32 1, %v4024_v14 }
 0xfd3   :  { %3816 = vrsqrt.f32 %v1268_v46  ;;  %vm1272_vm5 = vcmp.eq.f32.partialorder %v1268_v46, inf  ;;  %v1275_v61 = vand.u32 2147483648, %v1268_v46  ;;  %vm1274_vm6 = vcmp.eq.f32.partialorder %v1268_v46, 0.0 }
 0xfde   :  { %v3815_v48 = vpop.eup %3814 }
 0xfdf   :  { %v1278_v50 = vmul.f32 %v3815_v48, %v1269_v44  ;;  %v4443_v48 = vld [vmem:[%s4845_s3 + $0x178] sm:$0xff] }
 0xfe0   :  { %v3817_v54 = vpop.eup %3816 }
 0xfe1   :  { %v1280_v55 = vsel %vm1279_vm2, %v1269_v44, %v1278_v50  ;;  %v1271_v57 = vmul.f32 %v3817_v54, %v1268_v46  ;;  %v3023_v44 = vld [vmem:[%s4845_s3 + $0x80] sm:$0xff] }
 0xfe2   :  { %v1283_v56 = vsel %vm1281_vm4, %v1282_v53, %v1280_v55 }
 0xfe3   :  { %v1296_v58 = vadd.f32 1e-06, %v1283_v56  ;;  %v1273_v62 = vsel %vm1272_vm5, %v1268_v46, %v1271_v57  ;;  %v4438_v46 = vld [vmem:[%s4800_s15] sm:$0x7] }
 0xfe4   :  { %v1276_v63 = vsel %vm1274_vm6, %v1275_v61, %v1273_v62  ;;  %v1348_v50 = vrot.slane %v4438_v46, %v4027_v16  ;;  %v1352_v53 = vrot.slane %v4438_v46, %v1351_v45 }
 0xfe5   :  { %3818 = vrcp.f32 %v1296_v58  ;;  %v1295_v1 = vadd.f32 1e-06, %v1276_v63 }
 0xfe7   :  { %3820 = vrcp.f32 %v1295_v1 }
 0xff2   :  { %v3819_v5 = vpop.eup %3818 }
 0xff3   :  { %v1300_v59 = vmul.f32 %v3819_v5, %v1294_v7  ;;  %v3069_v7 = vld [vmem:[%s4845_s3 + $0x1f0] sm:$0xff] }
 0xff4   :  { %v3821_v9 = vpop.eup %3820 }
 0xff5   :  { %v1298_v60 = vmul.f32 %v3821_v9, %v1293_v8  ;;  %v1309_v13 = vadd.f32 %v2998_v11, %v1300_v59  ;;  %v3068_v8 = vld [vmem:[%s4845_s3 + $0x1e8] sm:$0xff]  ;;  %v3067_v59 = vld [vmem:[%s4845_s3 + $0x1e0] sm:$0xff]  ;;  %v3066_v9 = vld [vmem:[%s4845_s3 + $0x1d8] sm:$0xff] }
 0xff7   :  { %v1308_v12 = vadd.f32 %v2998_v11, %v1298_v60  ;;  %v3065_v11 = vld [vmem:[%s4845_s3 + $0x1d0] sm:$0xff]  ;;  %v3064_v60 = vld [vmem:[%s4845_s3 + $0x1c8] sm:$0xff] }
 0xff9   :  { %v1310_v30 = vpack.c.bf16 %v1309_v13, %v1308_v12  ;;  %v3063_v12 = vld [vmem:[%s4845_s3 + $0x1c0] sm:$0xff]  ;;  %v3062_v13 = vld [vmem:[%s4845_s3 + $0x1b8] sm:$0xff] }
 0xffb   :  { %1521 = vmatmul.mubr.bf16.vlgmr.msra.gmra.mxu0 %v1310_v30  ;;  %3478 = vmatmul.mubr.bf16.vlgmr.msra.gmra.mxu1 %v1310_v30  ;;  %v3061_v30 = vld [vmem:[%s4845_s3 + $0x1b0] sm:$0xff] }
 0xffc   :  { %3517 = vmatpush3.msra.mxu1 %v1589_v34  ;;  %3482 = vmatpush3.msra.mxu0 %v3038_v51  ;;  %v3033_v34 = vld [vmem:[%s4845_s3 + $0xd0] sm:$0xff]  ;;  %v3052_v51 = vld [vmem:[%s4845_s3 + $0x168] sm:$0xff] }
 0xffd   :  { %3518 = vmatprep.subr.mxu1 %v1588_v15  ;;  %3483 = vmatprep.subr.mxu0 %v3037_v28 }
 0xffe   :  { %3519 = vmatpush3.msra.mxu1 %v1588_v15  ;;  %3484 = vmatpush3.msra.mxu0 %v3037_v28  ;;  %v3060_v15 = vld [vmem:[%s4845_s3 + $0x1a8] sm:$0xff] }
 0xfff   :  { %3520 = vmatprep.subr.mxu1 %v1587_v26  ;;  %3485 = vmatprep.subr.mxu0 %v3036_v31 }
0x1000   :  { %3521 = vmatpush3.msra.mxu1 %v1587_v26  ;;  %3486 = vmatpush3.msra.mxu0 %v3036_v31  ;;  %v3059_v26 = vld [vmem:[%s4845_s3 + $0x1a0] sm:$0xff] }
0x1001   :  { %3522 = vmatprep.subr.mxu1 %v1586_v17  ;;  %3487 = vmatprep.subr.mxu0 %v3035_v32 }
0x1002   :  { %3523 = vmatpush3.msra.mxu1 %v1586_v17  ;;  %3488 = vmatpush3.msra.mxu0 %v3035_v32  ;;  %v3058_v17 = vld [vmem:[%s4845_s3 + $0x198] sm:$0xff] }
0x1003   :  { %3524 = vmatprep.subr.mxu1 %v1585_v18  ;;  %3489 = vmatprep.subr.mxu0 %v3034_v33  ;;  %v3050_v32 = vld [vmem:[%s4845_s3 + $0x158] sm:$0xff] }
0x1004   :  { %3525 = vmatpush3.msra.mxu1 %v1585_v18  ;;  %3490 = vmatpush3.msra.mxu0 %v3034_v33  ;;  %v3057_v18 = vld [vmem:[%s4845_s3 + $0x190] sm:$0xff] }
0x1005   :  { %3526 = vmatprep.subr.mxu1 %v1584_v19  ;;  %3491 = vmatprep.subr.mxu0 %v3033_v34 }
0x1006   :  { %3527 = vmatpush3.msra.mxu1 %v1584_v19  ;;  %3492 = vmatpush3.msra.mxu0 %v3033_v34  ;;  %v3056_v19 = vld [vmem:[%s4845_s3 + $0x188] sm:$0xff]  ;;  %v3049_v34 = vld [vmem:[%s4845_s3 + $0x150] sm:$0xff] }
0x1007   :  { %3528 = vmatprep.subr.mxu1 %v1583_v20  ;;  %3493 = vmatprep.subr.mxu0 %v3032_v35 }
0x1008   :  { %3529 = vmatpush3.msra.mxu1 %v1583_v20  ;;  %3494 = vmatpush3.msra.mxu0 %v3032_v35  ;;  %v3055_v20 = vld [vmem:[%s4845_s3 + $0x180] sm:$0xff]  ;;  %v3048_v35 = vld [vmem:[%s4845_s3 + $0x148] sm:$0xff] }
0x1009   :  { %3530 = vmatprep.subr.mxu1 %v1582_v49  ;;  %3495 = vmatprep.subr.mxu0 %v3031_v36 }
0x100a   :  { %3531 = vmatpush3.msra.mxu1 %v1582_v49  ;;  %3496 = vmatpush3.msra.mxu0 %v3031_v36  ;;  %v3047_v36 = vld [vmem:[%s4845_s3 + $0x140] sm:$0xff] }
0x100b   :  { %3532 = vmatprep.subr.mxu1 %v1581_v52  ;;  %3497 = vmatprep.subr.mxu0 %v3030_v37 }
0x100c   :  { %3533 = vmatpush3.msra.mxu1 %v1581_v52  ;;  %3498 = vmatpush3.msra.mxu0 %v3030_v37  ;;  %v3046_v37 = vld [vmem:[%s4845_s3 + $0x138] sm:$0xff] }
0x100d   :  { %3534 = vmatprep.subr.mxu1 %v1580_v21  ;;  %3499 = vmatprep.subr.mxu0 %v3029_v38 }
0x100e   :  { %3535 = vmatpush3.msra.mxu1 %v1580_v21  ;;  %3500 = vmatpush3.msra.mxu0 %v3029_v38  ;;  %v3045_v38 = vld [vmem:[%s4845_s3 + $0x130] sm:$0xff] }
0x100f   :  { %3536 = vmatprep.subr.mxu1 %v1579_v22  ;;  %3501 = vmatprep.subr.mxu0 %v3028_v39 }
0x1010   :  { %3537 = vmatpush3.msra.mxu1 %v1579_v22  ;;  %3502 = vmatpush3.msra.mxu0 %v3028_v39  ;;  %v3044_v39 = vld [vmem:[%s4845_s3 + $0x128] sm:$0xff] }
0x1011   :  { %3538 = vmatprep.subr.mxu1 %v1578_v23  ;;  %3503 = vmatprep.subr.mxu0 %v3027_v40 }
0x1012   :  { %3539 = vmatpush3.msra.mxu1 %v1578_v23  ;;  %3504 = vmatpush3.msra.mxu0 %v3027_v40  ;;  %v3043_v40 = vld [vmem:[%s4845_s3 + $0x120] sm:$0xff] }
0x1013   :  { %3540 = vmatprep.subr.mxu1 %v1577_v24  ;;  %3505 = vmatprep.subr.mxu0 %v3026_v41 }
0x1014   :  { %3541 = vmatpush3.msra.mxu1 %v1577_v24  ;;  %3506 = vmatpush3.msra.mxu0 %v3026_v41  ;;  %v3042_v41 = vld [vmem:[%s4845_s3 + $0x118] sm:$0xff] }
0x1015   :  { %3542 = vmatprep.subr.mxu1 %v1576_v25  ;;  %3507 = vmatprep.subr.mxu0 %v3025_v42 }
0x1016   :  { %3543 = vmatpush3.msra.mxu1 %v1576_v25  ;;  %3508 = vmatpush3.msra.mxu0 %v3025_v42  ;;  %v3053_v25 = vld [vmem:[%s4845_s3 + $0x170] sm:$0xff] }
0x1017   :  { %3544 = vmatprep.subr.mxu1 %v1575_v27  ;;  %3509 = vmatprep.subr.mxu0 %v3024_v43  ;;  %v3041_v42 = vld [vmem:[%s4845_s3 + $0x110] sm:$0xff] }
0x1018   :  { %3545 = vmatpush3.msra.mxu1 %v1575_v27  ;;  %3510 = vmatpush3.msra.mxu0 %v3024_v43  ;;  %v3040_v43 = vld [vmem:[%s4845_s3 + $0x108] sm:$0xff] }
0x1019   :  { %3546 = vmatprep.subr.mxu1 %v1574_v47  ;;  %3511 = vmatprep.subr.mxu0 %v3023_v44 }
0x101a   :  { %3547 = vmatpush3.msra.mxu1 %v1574_v47  ;;  %3512 = vmatpush3.msra.mxu0 %v3023_v44  ;;  %v3039_v44 = vld [vmem:[%s4845_s3 + $0x100] sm:$0xff] }
0x101b   :  { %3586 = vmatprep.subr.mxu1 %v4389_v29  ;;  %3551 = vmatprep.subr.mxu0 %v4443_v48 }
0x10bb   :  { %v1522_v54 = vpop.f32.mrf.mxu0  ;;  %v4449_v55 = vpop.f32.mrf.mxu1 }
0x10bc   :  { %v4451_v58 = vadd.f32 %v1522_v54, %v1348_v50 }
0x10bd   :  { %v1524_v56 = vpop.f32.mrf.mxu0  ;;  %v3479_v57 = vpop.f32.mrf.mxu1 }
0x10be   :  { %v1525_v61 = vadd.f32 %v1524_v56, %v1352_v53 }
0x10bf   :  { %v1526_v62 = vpop.f32.mrf.mxu0  ;;  %v4453_v63 = vpop.f32.mrf.mxu1 }
0x10c0   :  { %1592 = vrot.lane.b32.xlu1 %v1525_v61, %s3850_s6  ;;  %v1572_v1 = vmul.f32 %v1525_v61, %v4451_v58  ;;  %v4457_v16 = vadd.f32 %v1526_v62, %v1348_v50 }
0x10c1   :  { %v1528_v2 = vpop.f32.mrf.mxu0  ;;  %v3480_v3 = vpop.f32.mrf.mxu1 }
0x10c2   :  { %v1529_v4 = vadd.f32 %v1528_v2, %v1352_v53  ;;  %3548 = vmatprep.mubr.f32.mxu1 %v1572_v1 }
0x10c4   :  { %1594 = vrot.lane.b32.xlu0 %v1529_v4, %s3850_s6  ;;  %1767 = vrot.lane.b32.xlu1 %v1525_v61, %s3851_s7  ;;  %v1573_v5 = vmul.f32 %v1529_v4, %v4457_v16 }
0x10c6   :  { %3549 = vmatmul.mubr.f32.vlgmr.msra.gmra.mxu1 %v1573_v5 }
0x10c7   :  { %3587 = vmatpush3.msra.mxu1 %v4389_v29  ;;  %v3051_v29 = vld [vmem:[%s4845_s3 + $0x160] sm:$0xff] }
0x10c8   :  { %1769 = vrot.lane.b32.xlu0 %v1529_v4, %s3851_s7  ;;  %1869 = vrot.lane.b32.xlu1 %v1525_v61, %s3852_s13 }
0x10c9   :  { %3588 = vmatprep.subr.mxu1 %v3069_v7 }
0x10ca   :  { %3589 = vmatpush3.msra.mxu1 %v3069_v7 }
0x10cb   :  { %3590 = vmatprep.subr.mxu1 %v3068_v8 }
0x10cc   :  { %1871 = vrot.lane.b32.xlu0 %v1529_v4, %s3852_s13  ;;  %3591 = vmatpush3.msra.mxu1 %v3068_v8  ;;  %v1355_v8 = vsub.s32 2, %v4024_v14  ;;  %v1984_v14 = vld [vmem:[%s4801_s18 + $0x8] sm:$0xff] }
0x10cd   :  { %3592 = vmatprep.subr.mxu1 %v3067_v59 }
0x10ce   :  { %3593 = vmatpush3.msra.mxu1 %v3067_v59  ;;  %v1356_v59 = vrot.slane %v4438_v46, %v1355_v8  ;;  %v1983_v46 = vld [vmem:[%s4801_s18] sm:$0xff] }
0x10cf   :  { %3594 = vmatprep.subr.mxu1 %v3066_v9 }
0x10d0   :  { %3595 = vmatpush3.msra.mxu1 %v3066_v9  ;;  %v4574_v9 = vadd.f32 %v4453_v63, %v1356_v59 }
0x10d1   :  { %3596 = vmatprep.subr.mxu1 %v3065_v11 }
0x10d2   :  { %3597 = vmatpush3.msra.mxu1 %v3065_v11  ;;  %v4579_v11 = vadd.f32 %v4449_v55, %v1356_v59 }
0x10d3   :  { %3598 = vmatprep.subr.mxu1 %v3064_v60 }
0x10d4   :  { %3599 = vmatpush3.msra.mxu1 %v3064_v60 }
0x10d5   :  { %3600 = vmatprep.subr.mxu1 %v3063_v12 }
0x10d6   :  { %3601 = vmatpush3.msra.mxu1 %v3063_v12 }
0x10d7   :  { %3602 = vmatprep.subr.mxu1 %v3062_v13 }
0x10d8   :  { %3603 = vmatpush3.msra.mxu1 %v3062_v13 }
0x10d9   :  { %3604 = vmatprep.subr.mxu1 %v3061_v30 }
0x10da   :  { %3605 = vmatpush3.msra.mxu1 %v3061_v30 }
0x10db   :  { %3606 = vmatprep.subr.mxu1 %v3060_v15 }
0x10dc   :  { %3607 = vmatpush3.msra.mxu1 %v3060_v15 }
0x10dd   :  { %3608 = vmatprep.subr.mxu1 %v3059_v26 }
0x10de   :  { %3609 = vmatpush3.msra.mxu1 %v3059_v26 }
0x10df   :  { %3610 = vmatprep.subr.mxu1 %v3058_v17 }
0x10e0   :  { %3611 = vmatpush3.msra.mxu1 %v3058_v17  ;;  %v2071_v17 = vld [vmem:[%s4802_s17 + $0x8] sm:$0xff] }
0x10e1   :  { %3612 = vmatprep.subr.mxu1 %v3057_v18 }
0x10e2   :  { %3613 = vmatpush3.msra.mxu1 %v3057_v18  ;;  %v3076_v18 = vld [vmem:[%s4802_s17 + $0x18] sm:$0xff] }
0x10e3   :  { %3614 = vmatprep.subr.mxu1 %v3056_v19 }
0x10e4   :  { %3615 = vmatpush3.msra.mxu1 %v3056_v19  ;;  %v2070_v19 = vld [vmem:[%s4802_s17] sm:$0xff] }
0x10e5   :  { %3616 = vmatprep.subr.mxu1 %v3055_v20 }
0x10e6   :  { %3617 = vmatpush3.msra.mxu1 %v3055_v20  ;;  %v3075_v20 = vld [vmem:[%s4802_s17 + $0x10] sm:$0xff] }
0x10e7   :  { %3635 = vmatprep.subr.mxu1 %v3076_v18 }
0x1132   :  { %v1593_v49 = vpop.permute.xlu1 %1592 }
0x1133   :  { %v1598_v52 = vmul.f32 %v1593_v49, %v4451_v58  ;;  %v3080_v49 = vld [vmem:[%s4802_s17 + $0x28] sm:$0xff] }
0x1135   :  { %3513 = vmatprep.mubr.f32.mxu0 %v1598_v52  ;;  %v3084_v52 = vld [vmem:[%s4802_s17 + $0x38] sm:$0xff] }
0x1136   :  { %v1595_v21 = vpop.permute.xlu0 %1594  ;;  %v1768_v22 = vpop.permute.xlu1 %1767 }
0x1137   :  { %v1599_v23 = vmul.f32 %v1595_v21, %v4457_v16  ;;  %v1773_v24 = vmul.f32 %v1768_v22, %v4451_v58 }
0x1139   :  { %3514 = vmatmul.mubr.f32.vlgmr.msra.gmra.mxu0 %v1599_v23 }
0x113a   :  { %3552 = vmatpush3.msra.mxu0 %v4443_v48  ;;  %v1770_v27 = vpop.permute.xlu0 %1769  ;;  %v1870_v47 = vpop.permute.xlu1 %1869  ;;  %3583 = vmatprep.mubr.f32.mxu0 %v1773_v24 }
0x113b   :  { %v1875_v28 = vmul.f32 %v1870_v47, %v4451_v58  ;;  %3553 = vmatprep.subr.mxu0 %v3053_v25  ;;  %v1774_v45 = vmul.f32 %v1770_v27, %v4457_v16  ;;  %v3079_v47 = vld [vmem:[%s4802_s17 + $0x20] sm:$0xff] }
0x113c   :  { %3554 = vmatpush3.msra.mxu0 %v3053_v25 }
0x113d   :  { %3555 = vmatprep.subr.mxu0 %v3052_v51  ;;  %3618 = vmatprep.mubr.f32.mxu1 %v1875_v28  ;;  %v3764_v28 = vld [vmem:[%s4803_s19 + $0x38] sm:$0xff]  }
0x113e   :  { %3556 = vmatpush3.msra.mxu0 %v3052_v51  ;;  %v1872_v31 = vpop.permute.xlu0 %1871  ;;  %v3083_v51 = vld [vmem:[%s4802_s17 + $0x30] sm:$0xff] }
0x113f   :  { %v1876_v33 = vmul.f32 %v1872_v31, %v4457_v16  ;;  %3557 = vmatprep.subr.mxu0 %v3051_v29  ;;  %v3766_v31 = vld [vmem:[%s4803_s19 + $0x28] sm:$0xff]  }
0x1140   :  { %3558 = vmatpush3.msra.mxu0 %v3051_v29  ;;  %v3765_v29 = vld [vmem:[%s4803_s19 + $0x30] sm:$0xff]  }
0x1141   :  { %3559 = vmatprep.subr.mxu0 %v3050_v32  ;;  %3619 = vmatmul.mubr.f32.vlgmr.msra.gmra.mxu1 %v1876_v33  ;;  %v3768_v33 = vld [vmem:[%s4803_s19 + $0x18] sm:$0xff]  }
0x1142   :  { %3560 = vmatpush3.msra.mxu0 %v3050_v32  ;;  %3636 = vmatpush3.msra.mxu1 %v3076_v18  ;;  %v3767_v32 = vld [vmem:[%s4803_s19 + $0x20] sm:$0xff]  }
0x1143   :  { %3561 = vmatprep.subr.mxu0 %v3049_v34  ;;  %3637 = vmatprep.subr.mxu1 %v3075_v20 }
0x1144   :  { %3562 = vmatpush3.msra.mxu0 %v3049_v34  ;;  %3638 = vmatpush3.msra.mxu1 %v3075_v20  ;;  %v3769_v34 = vld [vmem:[%s4803_s19 + $0x10] sm:$0xff]  }
0x1145   :  { %3563 = vmatprep.subr.mxu0 %v3048_v35  ;;  %3649 = vmatprep.subr.mxu1 %v3084_v52 }
0x1146   :  { %3564 = vmatpush3.msra.mxu0 %v3048_v35  ;;  %v3770_v35 = vld [vmem:[%s4803_s19 + $0x8] sm:$0xff]  }
0x1147   :  { %3565 = vmatprep.subr.mxu0 %v3047_v36 }
0x1148   :  { %3566 = vmatpush3.msra.mxu0 %v3047_v36  ;;  %v3771_v36 = vld [vmem:[%s4803_s19] sm:$0xff]  }
0x1149   :  { %3567 = vmatprep.subr.mxu0 %v3046_v37 }
0x114a   :  { %3568 = vmatpush3.msra.mxu0 %v3046_v37 }
0x114b   :  { %3569 = vmatprep.subr.mxu0 %v3045_v38 }
0x114c   :  { %3570 = vmatpush3.msra.mxu0 %v3045_v38 }
0x114d   :  { %3571 = vmatprep.subr.mxu0 %v3044_v39 }
0x114e   :  { %3572 = vmatpush3.msra.mxu0 %v3044_v39 }
0x114f   :  { %3573 = vmatprep.subr.mxu0 %v3043_v40 }
0x1150   :  { %3574 = vmatpush3.msra.mxu0 %v3043_v40 }
0x1151   :  { %3575 = vmatprep.subr.mxu0 %v3042_v41 }
0x1152   :  { %3576 = vmatpush3.msra.mxu0 %v3042_v41 }
0x1153   :  { %3577 = vmatprep.subr.mxu0 %v3041_v42 }
0x1154   :  { %3578 = vmatpush3.msra.mxu0 %v3041_v42 }
0x1155   :  { %3579 = vmatprep.subr.mxu0 %v3040_v43 }
0x1156   :  { %3580 = vmatpush3.msra.mxu0 %v3040_v43 }
0x1157   :  { %3581 = vmatprep.subr.mxu0 %v3039_v44 }
0x1158   :  { %3582 = vmatpush3.msra.mxu0 %v3039_v44 }
0x1159   :  { %3584 = vmatmul.mubr.f32.vlgmr.msra.gmra.mxu0 %v1774_v45  ;;  %3621 = vmatprep.subr.mxu0 %v1984_v14 }
0x115a   :  { %3622 = vmatpush3.msra.mxu0 %v1984_v14 }
0x115b   :  { %3623 = vmatprep.subr.mxu0 %v1983_v46 }
0x115c   :  { %3624 = vmatpush3.msra.mxu0 %v1983_v46 }
0x115d   :  { %3628 = vmatprep.subr.mxu0 %v2071_v17 }
0x1186   :  { %v3550_v48 = vpop.f32.mrf.mxu1 }
0x1188   :  { %v1758_v53 = vpop.f32.mrf.mxu1 }
0x11f9   :  { %v3515_v50 = vpop.f32.mrf.mxu0 }
0x11fa   :  { %v1764_v56 = vadd.f32 %v3550_v48, %v3515_v50 }
0x11fb   :  { %v1683_v54 = vpop.f32.mrf.mxu0 }
0x11fc   :  { %v1759_v61 = vadd.f32 %v1758_v53, %v1683_v54 }
0x1201   :  { %v3620_v57 = vpop.f32.mrf.mxu1 }
0x1203   :  { %v1960_v4 = vpop.f32.mrf.mxu1 }
0x1219   :  { %v3585_v58 = vpop.f32.mrf.mxu0 }
0x121a   :  { %v1868_v62 = vadd.f32 %v3585_v58, %v1764_v56 }
0x121b   :  { %v1858_v1 = vpop.f32.mrf.mxu0 }
0x121c   :  { %v4563_v2 = vadd.f32 %v3620_v57, %v1868_v62  ;;  %v1867_v3 = vadd.f32 %v1858_v1, %v1759_v61 }
0x121e   :  { %v4565_v5 = vadd.f32 %v1960_v4, %v1867_v3  ;;  %v1974_v16 = vsel %vm250_vm8, %v4563_v2, -inf }
0x121f   :  { %1975 = vmax.xlane.f32.xlu0 %v1974_v16 }
0x1220   :  { %v1971_v7 = vsel %vm250_vm8, %v4565_v5, -inf }
0x1221   :  { %1972 = vmax.xlane.f32.xlu1 %v1971_v7 }
0x1232   :  { %2237 = vrot.lane.b32.xlu1 %v4574_v9, %s3850_s6 }
0x1235   :  { %2235 = vrot.lane.b32.xlu0 %v4579_v11, %s3850_s6 }
0x1236   :  { %2323 = vrot.lane.b32.xlu1 %v4579_v11, %s3851_s7 }
0x1239   :  { %2325 = vrot.lane.b32.xlu0 %v4574_v9, %s3851_s7 }
0x123a   :  { %2411 = vrot.lane.b32.xlu1 %v4579_v11, %s3852_s13 }
0x123d   :  { %2413 = vrot.lane.b32.xlu0 %v4574_v9, %s3852_s13 }
0x12a8   :  { %v1976_v55 = vpop.xlane.xlu0 %1975 }
0x12a9   :  { %v1978_v63 = vsub.f32 %v4563_v2, %v1976_v55 }
0x12aa   :  { %v1973_v60 = vpop.xlane.xlu1 %1972 }
0x12ab   :  { %v1977_v12 = vsub.f32 %v4565_v5, %v1973_v60  ;;  %v1981_v13 = vmul.f32 1.442695, %v1978_v63 }
0x12ac   :  { %v2236_v37 = vpop.permute.xlu0 %2235 }
0x12ad   :  { %v1979_v30 = vmul.f32 1.442695, %v1977_v12 }
0x12ae   :  { %v2238_v38 = vpop.permute.xlu1 %2237 }
0x12af   :  { %3822 = vpow2.f32 %v1979_v30 }
0x12b0   :  { %3824 = vpow2.f32 %v1981_v13  ;;  %v2326_v45 = vpop.permute.xlu0 %2325 }
0x12b2   :  { %v2324_v48 = vpop.permute.xlu1 %2323 }
0x12b4   :  { %v2414_v16 = vpop.permute.xlu0 %2413 }
0x12b6   :  { %v2412_v7 = vpop.permute.xlu1 %2411 }
0x12bc   :  { %v3823_v15 = vpop.eup %3822 }
0x12bd   :  { %v3825_v26 = vpop.eup %3824  ;;  %3625 = vmatprep.mubr.msk.f32.mxu0 %vm250_vm8, %v3823_v15 }
0x12be   :  { %3626 = vmatmul.mubr.msk.f32.vlgmr.msra.gmra.mxu0 %vm250_vm8, %v3825_v26 }
0x12bf   :  { %3629 = vmatpush3.msra.mxu0 %v2071_v17 }
0x12c0   :  { %3630 = vmatprep.subr.mxu0 %v2070_v19 }
0x12c1   :  { %3631 = vmatpush3.msra.mxu0 %v2070_v19 }
0x12c2   :  { %3642 = vmatprep.subr.mxu0 %v3080_v49 }
0x137e   :  { %v3627_v21 = vpop.f32.mrf.mxu0 }
0x137f   :  { %3826 = vrcp.f32 %v3627_v21 }
0x1380   :  { %v2057_v22 = vpop.f32.mrf.mxu0 }
0x1381   :  { %3828 = vrcp.f32 %v2057_v22 }
0x138c   :  { %v3827_v23 = vpop.eup %3826 }
0x138d   :  { %v2069_v27 = vmul.f32 %v3827_v23, %v3825_v26 }
0x138e   :  { %v3829_v24 = vpop.eup %3828 }
0x138f   :  { %v2068_v25 = vmul.f32 %v3829_v24, %v3823_v15 }
0x1391   :  { %3632 = vmatprep.mubr.msk.f32.mxu0 %vm250_vm8, %v2068_v25  ;;  %3639 = vmatprep.mubr.msk.f32.mxu1 %vm250_vm8, %v2068_v25 }
0x1392   :  { %3633 = vmatmul.mubr.msk.f32.vlgmr.msra.gmra.mxu0 %vm250_vm8, %v2069_v27  ;;  %3640 = vmatmul.mubr.msk.f32.vlgmr.msra.gmra.mxu1 %vm250_vm8, %v2069_v27 }
0x1393   :  { %3643 = vmatpush3.msra.mxu0 %v3080_v49  ;;  %3646 = vmatprep.mubr.msk.f32.mxu0 %vm250_vm8, %v2068_v25 }
0x1394   :  { %3650 = vmatpush3.msra.mxu1 %v3084_v52  ;;  %3653 = vmatprep.mubr.msk.f32.mxu1 %vm250_vm8, %v2068_v25 }
0x1395   :  { %3644 = vmatprep.subr.mxu0 %v3079_v47  ;;  %3651 = vmatprep.subr.mxu1 %v3083_v51 }
0x1396   :  { %3645 = vmatpush3.msra.mxu0 %v3079_v47  ;;  %3652 = vmatpush3.msra.mxu1 %v3083_v51 }
0x1397   :  { %3647 = vmatmul.mubr.msk.f32.vlgmr.msra.gmra.mxu0 %vm250_vm8, %v2069_v27  ;;  %3654 = vmatmul.mubr.msk.f32.vlgmr.msra.gmra.mxu1 %vm250_vm8, %v2069_v27 }
0x1398   :  { %3656 = vmatprep.subr.bf16.mxu0 %v3846_v0  ;;  %3672 = vmatprep.mubr.msk.bf16.mxu0 %vm3847_vm1, %v3846_v0 }
0x1399   :  { %3657 = vmatpush3.bf16.msra.mxu0 %v3764_v28  ;;  %3676 = vmatprep.subr.bf16.mxu1 %v3846_v0 }
0x139a   :  { %3658 = vmatprep.subr.bf16.mxu0 %v3846_v0  ;;  %3680 = vmatprep.mubr.msk.bf16.mxu1 %vm3847_vm1, %v3846_v0 }
0x139d   :  { %3659 = vmatpush3.bf16.msra.mxu0 %v3765_v29  ;;  %v3772_v29 = vld [vmem:[%s4805_s21 + $0x8] sm:$0xff]  }
0x139e   :  { %3660 = vmatprep.subr.bf16.mxu0 %v3846_v0  ;;  %3677 = vmatpush3.bf16.msra.mxu1 %v3772_v29  ;;  %v2815_v29 = vld [vmem:[%s4811_s25 + $0x8] sm:$0xff] }
0x139f   :  { %3678 = vmatprep.subr.bf16.mxu1 %v3846_v0 }
0x13a1   :  { %3661 = vmatpush3.bf16.msra.mxu0 %v3766_v31  ;;  %v3773_v31 = vld [vmem:[%s4805_s21] sm:$0xff]  }
0x13a2   :  { %3662 = vmatprep.subr.bf16.mxu0 %v3846_v0  ;;  %3679 = vmatpush3.bf16.msra.mxu1 %v3773_v31  ;;  %v2814_v31 = vld [vmem:[%s4811_s25] sm:$0xff] }
0x13a3   :  { %3684 = vmatprep.subr.bf16.mxu1 %v3846_v0 }
0x13a5   :  { %3663 = vmatpush3.bf16.msra.mxu0 %v3767_v32 }
0x13a6   :  { %3664 = vmatprep.subr.bf16.mxu0 %v3846_v0 }
0x13a9   :  { %3665 = vmatpush3.bf16.msra.mxu0 %v3768_v33 }
0x13aa   :  { %3666 = vmatprep.subr.bf16.mxu0 %v3846_v0 }
0x13ad   :  { %3667 = vmatpush3.bf16.msra.mxu0 %v3769_v34 }
0x13ae   :  { %3668 = vmatprep.subr.bf16.mxu0 %v3846_v0 }
0x13b1   :  { %3669 = vmatpush3.bf16.msra.mxu0 %v3770_v35 }
0x13b2   :  { %3670 = vmatprep.subr.bf16.mxu0 %v3846_v0 }
0x13b5   :  { %3671 = vmatpush3.bf16.msra.mxu0 %v3771_v36 }
0x1452   :  { %v3634_v39 = vpop.f32.mrf.mxu0  ;;  %v3641_v40 = vpop.f32.mrf.mxu1 }
0x1453   :  { %v2154_v41 = vmul.f32 %v3634_v39, %v4574_v9  ;;  %v2242_v42 = vmul.f32 %v3641_v40, %v2238_v38 }
0x1454   :  { %v2144_v43 = vpop.f32.mrf.mxu0  ;;  %v2224_v44 = vpop.f32.mrf.mxu1 }
0x1455   :  { %v2153_v50 = vmul.f32 %v2144_v43, %v4579_v11  ;;  %v2241_v53 = vmul.f32 %v2236_v37, %v2224_v44  ;;  %v2244_v57 = vadd.f32 %v2242_v42, %v2154_v41  ;;  %v3087_v11 = vld [vmem:[%s4804_s20] ss:$0 sm:$0xff] }
0x1457   :  { %v3648_v54 = vpop.f32.mrf.mxu0  ;;  %v3655_v56 = vpop.f32.mrf.mxu1  ;;  %v2243_v1 = vadd.f32 %v2241_v53, %v2153_v50 }
0x1458   :  { %v2330_v58 = vmul.f32 %v3648_v54, %v2326_v45  ;;  %v2418_v8 = vmul.f32 %v3655_v56, %v2414_v16  ;;  %v3096_v56 = vld [vmem:[%s4807_s11] ss:$0 sm:$0xff] }
0x1459   :  { %v2314_v61 = vpop.f32.mrf.mxu0  ;;  %v2402_v62 = vpop.f32.mrf.mxu1 }
0x145a   :  { %v2332_v3 = vadd.f32 %v2330_v58, %v2244_v57  ;;  %v2329_v4 = vmul.f32 %v2324_v48, %v2314_v61  ;;  %v2417_v9 = vmul.f32 %v2412_v7, %v2402_v62 }
0x145c   :  { %v2331_v59 = vadd.f32 %v2329_v4, %v2243_v1  ;;  %v2420_v14 = vadd.f32 %v2418_v8, %v2332_v3  ;;  %v3097_v3 = vld [vmem:[%s4808_s12] ss:$0 sm:$0xff]  ;;  %v3774_v8 = vld [vmem:[%s4806_s23 + $0x38] sm:$0xff]  }
0x145e   :  { %v2419_v46 = vadd.f32 %v2417_v9, %v2331_v59  ;;  %v3775_v9 = vld [vmem:[%s4806_s23 + $0x30] sm:$0xff]  }
0x1460   :  { %v2421_v55 = vpack.c.bf16 %v2420_v14, %v2419_v46  ;;  %v3776_v14 = vld [vmem:[%s4806_s23 + $0x28] sm:$0xff]   ;;  %v3777_v46 = vld [vmem:[%s4806_s23 + $0x20] sm:$0xff]  }
0x1462   :  { %3673 = vmatmul.mubr.bf16.vlgmr.msra.gmra.mxu0 %v2421_v55  ;;  %v3778_v55 = vld [vmem:[%s4806_s23 + $0x18] sm:$0xff]  }
0x1522   :  { %v2527_v63 = vpop.f32.mrf.mxu0 }
0x1523   :  { %v2528_v60 = vadd.f32 %v3087_v11, %v2527_v63  ;;  %v3780_v63 = vld [vmem:[%s4806_s23 + $0x8] sm:$0xff]  }
0x1524   :  { %v3674_v12 = vpop.f32.mrf.mxu0 }
0x1525   :  { %v4676_v13 = vadd.f32 %v2528_v60, %v4233_v6  ;;  %v3781_v60 = vld [vmem:[%s4806_s23] sm:$0xff]  }
0x1526   :  { %v2530_v30 = vpop.f32.mrf.mxu0  ;;  %v3098_v12 = vld [vmem:[%s4809_s22] ss:$0 sm:$0xff] }
0x1527   :  { %v2531_v15 = vadd.f32 %v3087_v11, %v2530_v30  ;;  %2538 = vrot.lane.b32.xlu1 %v4676_v13, %s3850_s6  ;;  %v3779_v11 = vld [vmem:[%s4806_s23 + $0x10] sm:$0xff]  }
0x1528   :  { %v3675_v26 = vpop.f32.mrf.mxu0 }
0x1529   :  { %v4681_v17 = vadd.f32 %v2531_v15, %v4238_v10 }
0x152b   :  { %2540 = vrot.lane.b32.xlu0 %v4681_v17, %s3850_s6 }
0x1599   :  { %v2539_v18 = vpop.permute.xlu1 %2538 }
0x159a   :  { %v2544_v19 = vsel %vm148_vm3, %v2539_v18, 0.0 }
0x159b   :  { %2545 = vadd.xlane.f32.xlu1 %v2544_v19 }
0x159d   :  { %v2541_v20 = vpop.permute.xlu0 %2540 }
0x159e   :  { %v2547_v6 = vsel %vm148_vm3, %v2541_v20, 0.0 }
0x159f   :  { %2548 = vadd.xlane.f32.xlu0 %v2547_v6 }
0x1624   :  { %v2546_v49 = vpop.xlane.xlu1 %2545 }
0x1625   :  { %v2551_v52 = vmul.f32 0.03125, %v2546_v49 }
0x1627   :  { %v2553_v21 = vsub.f32 %v4676_v13, %v2551_v52 }
0x1628   :  { %v2549_v22 = vpop.xlane.xlu0 %2548 }
0x1629   :  { %v2552_v23 = vmul.f32 0.03125, %v2549_v22  ;;  %v2555_v24 = vmul.f32 %v2553_v21, %v2553_v21  ;;  %v2816_v22 = vld [vmem:[%s4811_s25 + $0x10] sm:$0xff] }
0x162b   :  { %v2554_v10 = vsub.f32 %v4681_v17, %v2552_v23  ;;  %2559 = vrot.lane.b32.xlu0 %v2555_v24, %s3850_s6 }
0x162d   :  { %v2556_v25 = vmul.f32 %v2554_v10, %v2554_v10 }
0x162f   :  { %2561 = vrot.lane.b32.xlu1 %v2556_v25, %s3850_s6 }
0x169d   :  { %v2560_v27 = vpop.permute.xlu0 %2559 }
0x169e   :  { %v2565_v47 = vsel %vm148_vm3, %v2560_v27, 0.0 }
0x169f   :  { %2566 = vadd.xlane.f32.xlu1 %v2565_v47 }
0x16a1   :  { %v2562_v51 = vpop.permute.xlu1 %2561 }
0x16a2   :  { %v2568_v28 = vsel %vm148_vm3, %v2562_v51, 0.0 }
0x16a3   :  { %2569 = vadd.xlane.f32.xlu0 %v2568_v28 }
0x16b0   :  { %2598 = vrot.lane.b32.xlu1 %v2554_v10, %s3850_s6 }
0x16b9   :  { %2596 = vrot.lane.b32.xlu0 %v2553_v21, %s3850_s6  ;;  %v2817_v21 = vld [vmem:[%s4811_s25 + $0x18] sm:$0xff] }
0x16ba   :  { %3704 = vmatprep.subr.mxu0 %v2817_v21 }
0x16bb   :  { %3705 = vmatpush3.msra.mxu0 %v2817_v21 }
0x16bc   :  { %3706 = vmatprep.subr.mxu0 %v2816_v22 }
0x16bd   :  { %3707 = vmatpush3.msra.mxu0 %v2816_v22 }
0x16be   :  { %3708 = vmatprep.subr.mxu0 %v2815_v29 }
0x16bf   :  { %3709 = vmatpush3.msra.mxu0 %v2815_v29 }
0x16c0   :  { %3710 = vmatprep.subr.mxu0 %v2814_v31 }
0x16c1   :  { %3711 = vmatpush3.msra.mxu0 %v2814_v31 }
0x1728   :  { %v2567_v32 = vpop.xlane.xlu1 %2566 }
0x1729   :  { %v2571_v33 = vmul.f32 0.032258064, %v2567_v32 }
0x172b   :  { %3830 = vrsqrt.f32 %v2571_v33  ;;  %vm2575_vm7 = vcmp.eq.f32.partialorder %v2571_v33, inf  ;;  %v2578_v38 = vand.u32 2147483648, %v2571_v33  ;;  %vm2577_vm9 = vcmp.eq.f32.partialorder %v2571_v33, 0.0 }
0x172c   :  { %v2570_v34 = vpop.xlane.xlu0 %2569  ;;  %v2599_v57 = vpop.permute.xlu1 %2598 }
0x172d   :  { %v2572_v35 = vmul.f32 0.032258064, %v2570_v34  ;;  %v2603_v61 = vmul.f32 %v3096_v56, %v2599_v57 }
0x172f   :  { %3832 = vrsqrt.f32 %v2572_v35  ;;  %vm2582_vm10 = vcmp.eq.f32.partialorder %v2572_v35, inf  ;;  %v2585_v44 = vand.u32 2147483648, %v2572_v35  ;;  %vm2584_vm11 = vcmp.eq.f32.partialorder %v2572_v35, 0.0 }
0x1730   :  { %v2597_v53 = vpop.permute.xlu0 %2596 }
0x1731   :  { %v2602_v58 = vmul.f32 %v3096_v56, %v2597_v53 }
0x1738   :  { %v3831_v36 = vpop.eup %3830 }
0x1739   :  { %v2574_v37 = vmul.f32 %v3831_v36, %v2571_v33 }
0x173b   :  { %v2576_v39 = vsel %vm2575_vm7, %v2571_v33, %v2574_v37 }
0x173c   :  { %v3833_v40 = vpop.eup %3832  ;;  %v2579_v41 = vsel %vm2577_vm9, %v2578_v38, %v2576_v39  ;;  %v3111_v38 = vld [vmem:[%s4812_s26] ss:$0 sm:$0xff]  ;;  %s3854_s26 = smov 16  }
0x173d   :  { %v2581_v42 = vmul.f32 %v3833_v40, %v2572_v35  ;;  %v2604_v43 = vadd.f32 1e-06, %v2579_v41 }
0x173f   :  { %v2583_v45 = vsel %vm2582_vm10, %v2572_v35, %v2581_v42  ;;  %3834 = vrcp.f32 %v2604_v43 }
0x1740   :  { %v2586_v48 = vsel %vm2584_vm11, %v2585_v44, %v2583_v45 }
0x1741   :  { %v2605_v50 = vadd.f32 1e-06, %v2586_v48 }
0x1743   :  { %3836 = vrcp.f32 %v2605_v50 }
0x174c   :  { %v3835_v54 = vpop.eup %3834 }
0x174d   :  { %v2607_v62 = vmul.f32 %v3835_v54, %v2602_v58 }
0x174f   :  { %v2617_v7 = vadd.f32 %v3097_v3, %v2607_v62 }
0x1750   :  { %v3837_v1 = vpop.eup %3836 }
0x1751   :  { %v2609_v4 = vmul.f32 %v3837_v1, %v2603_v61 }
0x1753   :  { %v2618_v16 = vadd.f32 %v3097_v3, %v2609_v4 }
0x1755   :  { %v2619_v59 = vpack.c.bf16 %v2618_v16, %v2617_v7 }
0x1757   :  { %3681 = vmatmul.mubr.msk.bf16.vlgmr.msra.gmra.mxu1 %vm148_vm3, %v2619_v59 }
0x1758   :  { %3685 = vmatpush3.bf16.msra.mxu1 %v3774_v8  ;;  %3700 = vmatprep.mubr.msk.bf16.mxu1 %vm3847_vm1, %v3846_v0  ;;  %vm2910_vm1 = vcmask 48128  }
0x1759   :  { %3686 = vmatprep.subr.bf16.mxu1 %v3846_v0 }
0x175c   :  { %3687 = vmatpush3.bf16.msra.mxu1 %v3775_v9 }
0x175d   :  { %3688 = vmatprep.subr.bf16.mxu1 %v3846_v0 }
0x1760   :  { %3689 = vmatpush3.bf16.msra.mxu1 %v3776_v14 }
0x1761   :  { %3690 = vmatprep.subr.bf16.mxu1 %v3846_v0 }
0x1764   :  { %3691 = vmatpush3.bf16.msra.mxu1 %v3777_v46 }
0x1765   :  { %3692 = vmatprep.subr.bf16.mxu1 %v3846_v0 }
0x1768   :  { %3693 = vmatpush3.bf16.msra.mxu1 %v3778_v55 }
0x1769   :  { %3694 = vmatprep.subr.bf16.mxu1 %v3846_v0 }
0x176c   :  { %3695 = vmatpush3.bf16.msra.mxu1 %v3779_v11 }
0x176d   :  { %3696 = vmatprep.subr.bf16.mxu1 %v3846_v0 }
0x1770   :  { %3697 = vmatpush3.bf16.msra.mxu1 %v3780_v63 }
0x1771   :  { %3698 = vmatprep.subr.bf16.mxu1 %v3846_v0  ;;  %v3102_v0 = vld [vmem:[%s4810_s24] ss:$0 sm:$0xff] }
0x1774   :  { %3699 = vmatpush3.bf16.msra.mxu1 %v3781_v60 }
0x1817   :  { %v2680_v30 = vpop.f32.mrf.mxu1 }
0x1818   :  { %v2681_v26 = vadd.f32 %v3098_v12, %v2680_v30 }
0x1819   :  { %v3682_v15 = vpop.f32.mrf.mxu1 }
0x181a   :  { %v2687_v6 = vmax.f32 %v2681_v26, 0.0 }
0x181b   :  { %v2683_v18 = vpop.f32.mrf.mxu1 }
0x181c   :  { %v2684_v19 = vadd.f32 %v3098_v12, %v2683_v18 }
0x181d   :  { %v3683_v20 = vpop.f32.mrf.mxu1 }
0x181e   :  { %v2688_v49 = vmax.f32 %v2684_v19, 0.0 }
0x1820   :  { %v2689_v52 = vpack.c.bf16 %v2688_v49, %v2687_v6 }
0x1822   :  { %3701 = vmatmul.mubr.bf16.vlgmr.msra.gmra.mxu1 %v2689_v52 }
0x18e2   :  { %v2795_v23 = vpop.f32.mrf.mxu1 }
0x18e3   :  { %v2796_v24 = vadd.f32 %v3102_v0, %v2795_v23 }
0x18e4   :  { %v3702_v10 = vpop.f32.mrf.mxu1 }
0x18e5   :  { %v2802_v25 = vmul.f32 2.0, %v2796_v24 }
0x18e6   :  { %v2798_v27 = vpop.f32.mrf.mxu1 }
0x18e7   :  { %v2799_v47 = vadd.f32 %v3102_v0, %v2798_v27  ;;  %2806 = vrot.lane.b32.xlu1 %v2802_v25, %s3852_s13 }
0x18e8   :  { %v3703_v51 = vpop.f32.mrf.mxu1 }
0x18e9   :  { %v2803_v28 = vmul.f32 2.0, %v2799_v47 }
0x18eb   :  { %2808 = vrot.lane.b32.xlu0 %v2803_v28, %s3852_s13 }
0x1959   :  { %v2807_v32 = vpop.permute.xlu1 %2806 }
0x195a   :  { %v2812_v33 = vadd.f32 %v2807_v32, %v4676_v13 }
0x195c   :  { %2827 = vrot.lane.b32.xlu1 %v2812_v33, %s3850_s6 }
0x195d   :  { %v2809_v34 = vpop.permute.xlu0 %2808 }
0x195e   :  { %v2813_v35 = vadd.f32 %v2809_v34, %v4681_v17 }
0x1960   :  { %2829 = vrot.lane.b32.xlu0 %v2813_v35, %s3850_s6 }
0x19ce   :  { %v2828_v36 = vpop.permute.xlu1 %2827 }
0x19cf   :  { %3712 = vmatprep.mubr.msk.f32.mxu0 %vm148_vm3, %v2828_v36 }
0x19d2   :  { %v2830_v37 = vpop.permute.xlu0 %2829 }
0x19d3   :  { %3713 = vmatmul.mubr.msk.f32.vlgmr.msra.gmra.mxu0 %vm148_vm3, %v2830_v37  ;;  %vm2945_vm3 = vcmask 179200  }
0x1a93   :  { %v3714_v39 = vpop.f32.mrf.mxu0 }
0x1a94   :  { %v2907_v13 = vadd.f32 %v3714_v39, %v3111_v38 }
0x1a95   :  { %v2901_v40 = vpop.f32.mrf.mxu0 }
0x1a96   :  { %v2902_v41 = vadd.f32 %v3111_v38, %v2901_v40  ;;  %v2914_v42 = vsel %vm2910_vm1, %v2907_v13, -inf }
0x1a97   :  { %2915 = vmax.xlane.f32.xlu0 %v2914_v42 }
0x1a98   :  { %v2911_v17 = vsel %vm2910_vm1, %v2902_v41, -inf }
0x1a99   :  { %2912 = vmax.xlane.f32.xlu1 %v2911_v17 }
0x1b20   :  { %v2916_v43 = vpop.xlane.xlu0 %2915 }
0x1b21   :  { %v2918_v44 = vsub.f32 %v2907_v13, %v2916_v43 }
0x1b22   :  { %v2913_v45 = vpop.xlane.xlu1 %2912 }
0x1b23   :  { %v2921_v48 = vmul.f32 1.442695, %v2918_v44  ;;  %v2917_v50 = vsub.f32 %v2902_v41, %v2913_v45 }
0x1b25   :  { %3838 = vpow2.f32 %v2921_v48  ;;  %v2919_v53 = vmul.f32 1.442695, %v2917_v50 }
0x1b27   :  { %3840 = vpow2.f32 %v2919_v53 }
0x1b32   :  { %v3839_v54 = vpop.eup %3838 }
0x1b33   :  { %v2926_v56 = vsel %vm2910_vm1, %v3839_v54, 0.0 }
0x1b34   :  { %v3841_v57 = vpop.eup %3840  ;;  %2927 = vadd.xlane.f32.xlu1 %v2926_v56 }
0x1b35   :  { %v2923_v58 = vsel %vm2910_vm1, %v3841_v57, 0.0 }
0x1b36   :  { %2924 = vadd.xlane.f32.xlu0 %v2923_v58 }
0x1bbd   :  { %v2928_v61 = vpop.xlane.xlu1 %2927 }
0x1bbe   :  { %3842 = vlog2.f32 %v2928_v61 }
0x1bbf   :  { %v2925_v62 = vpop.xlane.xlu0 %2924 }
0x1bc0   :  { %3844 = vlog2.f32 %v2925_v62 }
0x1bcb   :  { %v3843_v1 = vpop.eup %3842 }
0x1bcc   :  { %v2932_v3 = vmul.f32 0.6931472, %v3843_v1 }
0x1bcd   :  { %v3845_v4 = vpop.eup %3844 }
0x1bce   :  { %v2930_v16 = vmul.f32 0.6931472, %v3845_v4  ;;  %v2934_v7 = vsub.f32 %v2918_v44, %v2932_v3 }
0x1bd0   :  { %2939 = vrot.lane.b32.xlu1 %v2934_v7, %s3854_s26  ;;  %v2933_v8 = vsub.f32 %v2917_v50, %v2930_v16 }
0x1bd2   :  { %2937 = vrot.lane.b32.xlu0 %v2933_v8, %s3854_s26 }
0x1c42   :  { %v2940_v59 = vpop.permute.xlu1 %2939 }
0x1c43   :  { %v2944_v9 = vsel %vm250_vm8, %v4563_v2, %v2940_v59 }
0x1c44   :  { %v2947_v14 = vsel %vm2945_vm3, %v2944_v9, 0.0  ;;  %v2938_v46 = vpop.permute.xlu0 %2937 }
0x1c45   :  { %2949 = vst [vmem:[%s4813_s27 + $0x8] sm:$0xff] %v2947_v14  ;;  %v2943_v55 = vsel %vm250_vm8, %v4565_v5, %v2938_v46 }
0x1c46   :  { %v2946_v11 = vsel %vm2945_vm3, %v2943_v55, 0.0 }
0x1c47   :  { %2948 = vst [vmem:[%s4813_s27] sm:$0xff] %v2946_v11 }

</bundles_post_ra>
